<compile_context>
chip_gen: v5e
topology: v5e:2x2
jax: 0.10.0
libtpu: 0.0.40
codegen_flags: <defaults>
</compile_context>

<pallas_src>
import functools

import jax
import jax.numpy as jnp
from jax import lax
from jax.experimental import pallas as pl
from jax.experimental.pallas import tpu as pltpu


# ----------------------------------------------------------------------------
# Lane-shift helper (pltpu.roll with a one-time, defensive semantics probe).
# ----------------------------------------------------------------------------
_LANE_SHIFT_MODE = None


def _probe_lane_shift_mode():
    """Detect pltpu.roll's rotation direction once; fall back to slice+concat."""
    global _LANE_SHIFT_MODE
    if _LANE_SHIFT_MODE is not None:
        return _LANE_SHIFT_MODE
    try:
        n = 128
        x = jnp.tile(jnp.arange(n, dtype=jnp.float32)[None, :], (8, 1))

        def _probe_kernel(x_ref, o_ref):
            o_ref[...] = pltpu.roll(x_ref[...], 1, axis=1)

        out = pl.pallas_call(
            _probe_kernel,
            out_shape=jax.ShapeDtypeStruct((8, n), jnp.float32),
        )(x)
        v0 = float(jax.device_get(out)[0, 0])
        if v0 == float(n - 1):      # numpy convention: out[j] = x[j - shift]
            _LANE_SHIFT_MODE = "roll_np"
        elif v0 == 1.0:             # inverted convention: out[j] = x[j + shift]
            _LANE_SHIFT_MODE = "roll_inv"
        else:
            _LANE_SHIFT_MODE = "concat"
    except Exception:
        _LANE_SHIFT_MODE = "concat"
    return _LANE_SHIFT_MODE


def _lane_shift(x, s):
    """y[..., j] = x[..., (j + s) % n]; wrapped lanes are don't-care (the
    boundary-masked tap weights zero them)."""
    n = x.shape[-1]
    s = s % n
    if s == 0:
        return x
    mode = _LANE_SHIFT_MODE
    if mode == "roll_np":
        return pltpu.roll(x, (n - s) % n, axis=x.ndim - 1)
    if mode == "roll_inv":
        return pltpu.roll(x, s, axis=x.ndim - 1)
    return jnp.concatenate([x[..., s:], x[..., :s]], axis=-1)


# ----------------------------------------------------------------------------
# Pallas depthwise KxK conv (stride 1, 'same' zero padding), NHWC layout.
# ----------------------------------------------------------------------------
def _dwconv_kernel(x_ref, w_ref, b_ref, o_ref, *, H, W, C, K):
    # x_ref: (1, H, W*C)   one image, rows flattened w-major / c-minor on lanes
    # w_ref: (K, K, W*C)   per-tap weights tiled across W, W-boundary masks folded
    # b_ref: (1, W*C)      bias tiled across W (f32)
    # o_ref: (1, H, W*C)
    WC = W * C
    pad = (K - 1) // 2
    bias = b_ref[...]                                      # (1, WC) f32

    row0 = 0
    while row0 < H:                                        # static 8-row strip loop
        Sh = min(8, H - row0)
        # Bias fused into the accumulator init (no separate full-array pass).
        acc = jnp.broadcast_to(bias, (Sh, WC)).astype(jnp.float32)
        for kh in range(K):
            dh = kh - pad
            start = row0 + dh
            lo = max(0, -start)                            # leading zero rows
            hi = min(Sh, H - start)                        # trailing zero rows start
            if hi <= lo:
                continue                                   # whole band out of range
            # Plain row-offset load of the band; H-boundary rows zero-filled here
            # (no padded copy of the activation in HBM).
            core = x_ref[0, pl.ds(start + lo, hi - lo), :].astype(jnp.float32)
            parts = []
            if lo > 0:
                parts.append(jnp.zeros((lo, WC), jnp.float32))
            parts.append(core)
            if hi < Sh:
                parts.append(jnp.zeros((Sh - hi, WC), jnp.float32))
            band = parts[0] if len(parts) == 1 else jnp.concatenate(parts, axis=0)
            for kw in range(K):
                # W shift == lane rotation by (kw - pad) * C (XLU), wrap masked
                # by the zeroed boundary taps in w_ref.
                shifted = _lane_shift(band, (kw - pad) * C)
                tap = w_ref[kh, kw, :]                     # (WC,) f32
                acc = acc + shifted * tap[None, :]
        # Lane-dense (W*C wide), sublane-aligned store.
        o_ref[0, pl.ds(row0, Sh), :] = acc.astype(o_ref.dtype)
        row0 += Sh


def dwconv2d_pallas(x_nhwc, weight_kkc, bias_c=None):
    """Depthwise KxK conv, stride 1, zero padding (K-1)//2, NHWC.

    x_nhwc:     (B, H, W, C)
    weight_kkc: (K, K, C)  == PyTorch (C, 1, K, K) weight transposed
    bias_c:     (C,) or None
    """
    _probe_lane_shift_mode()
    B, H, W, C = x_nhwc.shape
    K = weight_kkc.shape[0]
    pad = (K - 1) // 2
    WC = W * C

    # Per-tap weights tiled across W with the W-boundary zero mask folded in (f32).
    w_idx = jnp.arange(W)
    dws = jnp.arange(K) - pad
    valid = ((w_idx[None, :] + dws[:, None]) >= 0) & (
        (w_idx[None, :] + dws[:, None]) < W)                       # (K, W)
    w_tiled = jnp.broadcast_to(
        weight_kkc.astype(jnp.float32)[:, :, None, :], (K, K, W, C))
    w_eff = (w_tiled * valid.astype(jnp.float32)[None, :, :, None]).reshape(K, K, WC)

    if bias_c is None:
        bias_c = jnp.zeros((C,), jnp.float32)
    b_eff = jnp.tile(bias_c.astype(jnp.float32), W).reshape(1, WC)

    x_flat = x_nhwc.reshape(B, H, WC)                              # pure reshape
    kernel = functools.partial(_dwconv_kernel, H=H, W=W, C=C, K=K)

    out = pl.pallas_call(
        kernel,
        out_shape=jax.ShapeDtypeStruct((B, H, WC), x_nhwc.dtype),
        grid_spec=pltpu.PrefetchScalarGridSpec(
            num_scalar_prefetch=0,
            grid=(B,),
            in_specs=[
                pl.BlockSpec((1, H, WC), lambda b: (b, 0, 0)),
                pl.BlockSpec((K, K, WC), lambda b: (0, 0, 0)),
                pl.BlockSpec((1, WC), lambda b: (0, 0)),
            ],
            out_specs=pl.BlockSpec((1, H, WC), lambda b: (b, 0, 0)),
        ),
        compiler_params=pltpu.CompilerParams(
            dimension_semantics=("parallel",)),
    )(x_flat, w_eff, b_eff)
    return out.reshape(B, H, W, C)


def dwconv2d_reference(x_nhwc, weight_kkc, bias_c=None):
    """Pure-JAX depthwise conv reference (matches nn.Conv2d(groups=C))."""
    B, H, W, C = x_nhwc.shape
    K = weight_kkc.shape[0]
    pad = (K - 1) // 2
    rhs = weight_kkc.reshape(K, K, 1, C)                           # HWIO, groups=C
    out = lax.conv_general_dilated(
        x_nhwc, rhs, window_strides=(1, 1),
        padding=((pad, pad), (pad, pad)),
        dimension_numbers=("NHWC", "HWIO", "NHWC"),
        feature_group_count=C,
        precision=lax.Precision.HIGHEST)
    if bias_c is not None:
        out = out + bias_c[None, None, None, :]
    return out


# ----------------------------------------------------------------------------
# Pallas fused linear (+ optional ReLU) kernel.
# ----------------------------------------------------------------------------
def _linear_kernel(x_ref, w_ref, b_ref, o_ref, *, relu):
    acc = jnp.dot(x_ref[...], w_ref[...],
                  preferred_element_type=jnp.float32,
                  precision=lax.Precision.HIGHEST)
    acc = acc + b_ref[...]
    if relu:
        acc = jnp.maximum(acc, 0.0)
    o_ref[...] = acc.astype(o_ref.dtype)


def linear_pallas(x2d, w_kn, b_n, relu=False, block_m=256):
    """y = x2d @ w_kn + b_n (optionally fused ReLU); w_kn is (in, out)."""
    M, Kin = x2d.shape
    Kw, Nout = w_kn.shape
    assert Kin == Kw
    tm = min(block_m, M)
    kernel = functools.partial(_linear_kernel, relu=relu)
    return pl.pallas_call(
        kernel,
        out_shape=jax.ShapeDtypeStruct((M, Nout), x2d.dtype),
        grid_spec=pltpu.PrefetchScalarGridSpec(
            num_scalar_prefetch=0,
            grid=(pl.cdiv(M, tm),),
            in_specs=[
                pl.BlockSpec((tm, Kin), lambda i: (i, 0)),
                pl.BlockSpec((Kin, Nout), lambda i: (0, 0)),
                pl.BlockSpec((1, Nout), lambda i: (0, 0)),
            ],
            out_specs=pl.BlockSpec((tm, Nout), lambda i: (i, 0)),
        ),
        compiler_params=pltpu.CompilerParams(
            dimension_semantics=("parallel",)),
    )(x2d, w_kn, b_n.reshape(1, Nout).astype(jnp.float32))


# ----------------------------------------------------------------------------
# token2map / gaussian reconstruct / map2token (plain JAX; NHWC throughout).
# ----------------------------------------------------------------------------
def token2map_nhwc(x, loc, H, W):
    """Scatter tokens to an HxW grid; returns (feature (B,H,W,C), mask (B,H,W,1))."""
    B, N, C = x.shape
    scale = jnp.array([W - 1, H - 1], dtype=x.dtype)
    ij = jnp.round(jnp.clip(loc, 0.0, 1.0).astype(x.dtype) * scale).astype(jnp.int32)
    idx = ij[..., 0] + ij[..., 1] * W                              # (B, N)
    idx = idx + jnp.arange(B, dtype=jnp.int32)[:, None] * (H * W)
    src = jnp.concatenate([x, jnp.ones((B, N, 1), x.dtype)], axis=-1)
    out = jnp.zeros((B * H * W, C + 1), x.dtype).at[idx.reshape(-1)].add(
        src.reshape(B * N, C + 1))
    out = out.reshape(B, H, W, C + 1)
    feature, mask = out[..., :C], out[..., C:]
    feature = feature / (mask + 1e-6)
    mask = (mask > 0).astype(x.dtype)
    feature = feature * mask
    return feature, mask


def _gaussian_kernel2d(kernel_size, sigma):
    coords = jnp.arange(kernel_size, dtype=jnp.float32)
    mean = (kernel_size - 1) / 2.0
    g = jnp.exp(-((coords - mean) ** 2) / (2.0 * float(sigma) ** 2))
    k2 = jnp.outer(g, g)
    return k2 / jnp.sum(k2)


def reconstruct_feature_nhwc(feature, mask, kernel_size, sigma, depthwise_conv):
    if kernel_size < 3:
        return feature
    C = feature.shape[-1]
    feature = feature * mask
    inp = jnp.concatenate([feature, mask], axis=-1)                # (B,H,W,C+1)
    g2 = _gaussian_kernel2d(kernel_size, sigma)
    gw = jnp.broadcast_to(g2[:, :, None], (kernel_size, kernel_size, C + 1))
    out = depthwise_conv(inp, gw, None)
    feat_i, mask_i = out[..., :C], out[..., C:]
    feat_i = feat_i / (mask_i + 1e-6)
    mask_i = (mask_i > 0).astype(feature.dtype)
    feat_i = feat_i * mask_i
    return feature + (1.0 - mask) * feat_i


def map2token_nhwc(fm, loc):
    """F.grid_sample(mode='bilinear', align_corners=False, zeros padding)."""
    B, H, W, C = fm.shape
    gx = loc[..., 0].astype(fm.dtype) * 2.0 - 1.0
    gy = loc[..., 1].astype(fm.dtype) * 2.0 - 1.0
    ix = ((gx + 1.0) * W - 1.0) * 0.5
    iy = ((gy + 1.0) * H - 1.0) * 0.5
    x0 = jnp.floor(ix)
    y0 = jnp.floor(iy)
    x1 = x0 + 1.0
    y1 = y0 + 1.0
    wx1 = ix - x0
    wx0 = 1.0 - wx1
    wy1 = iy - y0
    wy0 = 1.0 - wy1
    flat = fm.reshape(B, H * W, C)

    def gather(xf, yf):
        valid = (xf >= 0) & (xf <= W - 1) & (yf >= 0) & (yf <= H - 1)
        xi = jnp.clip(xf.astype(jnp.int32), 0, W - 1)
        yi = jnp.clip(yf.astype(jnp.int32), 0, H - 1)
        idx = jnp.broadcast_to((yi * W + xi)[..., None], (B, xf.shape[1], C))
        v = jnp.take_along_axis(flat, idx, axis=1)                 # (B, N, C)
        return v * valid[..., None].astype(fm.dtype)

    return (gather(x0, y0) * (wx0 * wy0)[..., None]
            + gather(x1, y0) * (wx1 * wy0)[..., None]
            + gather(x0, y1) * (wx0 * wy1)[..., None]
            + gather(x1, y1) * (wx1 * wy1)[..., None])


# ----------------------------------------------------------------------------
# MyMlp forward (Pallas path and pure-JAX reference path share the JAX glue).
# ----------------------------------------------------------------------------
def my_mlp_forward(params, x, loc, H, W, kernel_size, sigma, *, use_pallas):
    B, N, Cin = x.shape
    hidden = params["w1"].shape[1]

    if use_pallas:
        linear = linear_pallas
        dwconv = dwconv2d_pallas
    else:
        def linear(x2d, w, b, relu=False):
            y = jnp.dot(x2d, w, precision=lax.Precision.HIGHEST) + b
            return jnp.maximum(y, 0.0) if relu else y
        dwconv = dwconv2d_reference

    # fc1 + ReLU (fused in the Pallas kernel)
    h = linear(x.reshape(B * N, Cin), params["w1"], params["b1"], relu=True)
    h = h.reshape(B, N, hidden)

    # MyDWConv: token2map -> gaussian reconstruct -> 3x3 depthwise conv -> map2token
    feat, mask = token2map_nhwc(h, loc, H, W)
    feat = reconstruct_feature_nhwc(feat, mask, kernel_size, sigma, dwconv)
    fm = dwconv(feat, params["dw_w"], params["dw_b"])
    t = map2token_nhwc(fm, loc)

    # Exact GELU (torch.nn.GELU default). Dropout(p=0.0) is the identity.
    t = jax.nn.gelu(t, approximate=False)
    out = linear(t.reshape(B * N, hidden), params["w2"], params["b2"], relu=False)
    return out.reshape(B, N, params["w2"].shape[1])


# ----------------------------------------------------------------------------
# Main: unit checks for the Pallas kernels + end-to-end MyMlp check.
# ----------------------------------------------------------------------------
if __name__ == "__main__":
    key = jax.random.PRNGKey(0)
    ks = jax.random.split(key, 14)

    # --- depthwise-conv kernel checks: multi-strip, C not a multiple of 128,
    #     K=5 halo, H not a multiple of 8, with/without bias ---
    for i, (tb, th, tw, tc, tk, with_bias) in enumerate(
            [(2, 16, 16, 32, 3, True), (1, 14, 12, 32, 5, False)]):
        kx_, kw_, kb_ = jax.random.split(ks[i], 3)
        xt = jax.random.normal(kx_, (tb, th, tw, tc), jnp.float32)
        wt = jax.random.normal(kw_, (tk, tk, tc), jnp.float32) * 0.3
        bt = jax.random.normal(kb_, (tc,), jnp.float32) * 0.2 if with_bias else None
        got = dwconv2d_pallas(xt, wt, bt)
        want = dwconv2d_reference(xt, wt, bt)
        assert got.shape == want.shape
        assert jnp.allclose(got, want, atol=2e-3, rtol=2e-3)

    # --- MyMlp end-to-end ---
    B, H, W = 2, 16, 16
    N = H * W
    in_features = 128
    hidden = 128          # MyMlp default: hidden_features = in_features
    out_features = 128    # MyMlp default: out_features = in_features
    kernel_size, sigma = 3, 2

    x = jax.random.normal(ks[2], (B, N, in_features), jnp.float32)
    loc = jax.random.uniform(ks[3], (B, N, 2), jnp.float32)

    dw_w_torch = jax.random.normal(ks[4], (hidden, 1, 3, 3), jnp.float32) * 0.3
    params = {
        # nn.Linear stores (out, in); these are the transposed (in, out) copies.
        "w1": jax.random.normal(ks[5], (in_features, hidden), jnp.float32) * 0.1,
        "b1": jax.random.normal(ks[6], (hidden,), jnp.float32) * 0.1,
        "w2": jax.random.normal(ks[7], (hidden, out_features), jnp.float32) * 0.1,
        "b2": jax.random.normal(ks[8], (out_features,), jnp.float32) * 0.1,
        # depthwise Conv2d(hidden, hidden, 3, groups=hidden): (C,1,3,3) -> (3,3,C)
        "dw_w": jnp.transpose(dw_w_torch[:, 0], (1, 2, 0)),
        "dw_b": jax.random.normal(ks[9], (hidden,), jnp.float32) * 0.1,
    }

    # fused linear kernel check
    x2d = x.reshape(B * N, in_features)
    got_lin = linear_pallas(x2d, params["w1"], params["b1"], relu=True)
    want_lin = jnp.maximum(
        jnp.dot(x2d, params["w1"], precision=lax.Precision.HIGHEST) + params["b1"],
        0.0)
    assert jnp.allclose(got_lin, want_lin, atol=1e-2, rtol=1e-2)

    out = my_mlp_forward(params, x, loc, H, W, kernel_size, sigma, use_pallas=True)
    out = jax.block_until_ready(out)
    ref = my_mlp_forward(params, x, loc, H, W, kernel_size, sigma, use_pallas=False)

    assert out.shape == (B, N, out_features)
    assert bool(jnp.all(jnp.isfinite(out)))
    assert jnp.allclose(out, ref, atol=1e-2, rtol=1e-2)

    print("KERNEL_OK")
</pallas_src>

<mosaic_0001>
module attributes {stable_mosaic.version = 11 : i64} {
  func.func @_probe_kernel(%arg0: memref<8x128xf32, #tpu.memory_space<vmem>>, %arg1: memref<8x128xf32, #tpu.memory_space<vmem>>) attributes {dimension_semantics = [], scalar_prefetch = 0 : i64, scratch_operands = 0 : i64, tpu.core_type = #tpu.core_type<tc>} {
    %c0 = arith.constant 0 : index
    %c0_0 = arith.constant 0 : index
    %0 = vector.load %arg0[%c0, %c0_0] : memref<8x128xf32, #tpu.memory_space<vmem>>, vector<8x128xf32>
    %c1_i32 = arith.constant 1 : i32
    %1 = tpu.dynamic_rotate %0 by %c1_i32 dim 1 : vector<8x128xf32>, i32 -> vector<8x128xf32>
    %c0_1 = arith.constant 0 : index
    %c0_2 = arith.constant 0 : index
    %2 = vector.load %arg1[%c0_1, %c0_2] : memref<8x128xf32, #tpu.memory_space<vmem>>, vector<8x128xf32>
    tpu.vector_store %arg1[%c0_1, %c0_2], %1 {strides = array<i32>} : memref<8x128xf32, #tpu.memory_space<vmem>>, vector<8x128xf32>,
    return
  }
}

module attributes {stable_mosaic.version = 11 : i64} {
  func.func @_dwconv_kernel(%arg0: i32, %arg1: memref<1x16x512xf32, #tpu.memory_space<vmem>>, %arg2: memref<3x3x512xf32, #tpu.memory_space<vmem>>, %arg3: memref<1x512xf32, #tpu.memory_space<vmem>>, %arg4: memref<1x16x512xf32, #tpu.memory_space<vmem>>) attributes {dimension_semantics = [#tpu.dimension_semantics<parallel>], iteration_bounds = array<i64: 2>, scalar_prefetch = 0 : i64, scratch_operands = 0 : i64, tpu.core_type = #tpu.core_type<tc>, window_params = [{transform_indices = @transform_0, window_bounds = array<i64: 1, 16, 512>}, {pipeline_mode = #tpu.pipeline_mode<synchronous>, transform_indices = @transform_1, window_bounds = array<i64: 3, 3, 512>}, {pipeline_mode = #tpu.pipeline_mode<synchronous>, transform_indices = @transform_2, window_bounds = array<i64: 1, 512>}, {transform_indices = @transform_3, window_bounds = array<i64: 1, 16, 512>}]} {
    %c0 = arith.constant 0 : index
    %c0_0 = arith.constant 0 : index
    %0 = vector.load %arg3[%c0, %c0_0] : memref<1x512xf32, #tpu.memory_space<vmem>>, vector<1x512xf32>
    %1 = vector.shape_cast %0 : vector<1x512xf32> to vector<1x512xf32>
    %2 = vector.broadcast %1 : vector<1x512xf32> to vector<8x512xf32>
    %c0_1 = arith.constant 0 : index
    %c0_2 = arith.constant 0 : index
    %c0_3 = arith.constant 0 : index
    %3 = vector.load %arg1[%c0_1, %c0_2, %c0_3] : memref<1x16x512xf32, #tpu.memory_space<vmem>>, vector<1x7x512xf32>
    %4 = vector.shape_cast %3 : vector<1x7x512xf32> to vector<7x512xf32>
    %cst = arith.constant 0.000000e+00 : f32
    %5 = vector.broadcast %cst : f32 to vector<1x512xf32>
    %6 = tpu.concatenate %5, %4 in 0 : vector<1x512xf32>, vector<7x512xf32> -> vector<8x512xf32>
    %7 = vector.extract_strided_slice %6 {offsets = [0, 480], sizes = [8, 32], strides = [1, 1]} : vector<8x512xf32> to vector<8x32xf32>
    %8 = vector.extract_strided_slice %6 {offsets = [0, 0], sizes = [8, 480], strides = [1, 1]} : vector<8x512xf32> to vector<8x480xf32>
    %9 = tpu.concatenate %7, %8 in 1 : vector<8x32xf32>, vector<8x480xf32> -> vector<8x512xf32>
    %c0_4 = arith.constant 0 : index
    %c0_5 = arith.constant 0 : index
    %c0_6 = arith.constant 0 : index
    %10 = vector.load %arg2[%c0_4, %c0_5, %c0_6] : memref<3x3x512xf32, #tpu.memory_space<vmem>>, vector<1x1x512xf32>
    %11 = vector.shape_cast %10 : vector<1x1x512xf32> to vector<512xf32>
    %12 = vector.shape_cast %11 : vector<512xf32> to vector<1x512xf32>
    %13 = vector.broadcast %12 : vector<1x512xf32> to vector<8x512xf32>
    %14 = arith.mulf %9, %13 : vector<8x512xf32>
    %15 = arith.addf %2, %14 : vector<8x512xf32>
    %c0_7 = arith.constant 0 : index
    %c1 = arith.constant 1 : index
    %c0_8 = arith.constant 0 : index
    %16 = vector.load %arg2[%c0_7, %c1, %c0_8] : memref<3x3x512xf32, #tpu.memory_space<vmem>>, vector<1x1x512xf32>
    %17 = vector.shape_cast %16 : vector<1x1x512xf32> to vector<512xf32>
    %18 = vector.shape_cast %17 : vector<512xf32> to vector<1x512xf32>
    %19 = vector.broadcast %18 : vector<1x512xf32> to vector<8x512xf32>
    %20 = arith.mulf %6, %19 : vector<8x512xf32>
    %21 = arith.addf %15, %20 : vector<8x512xf32>
    %22 = vector.extract_strided_slice %6 {offsets = [0, 32], sizes = [8, 480], strides = [1, 1]} : vector<8x512xf32> to vector<8x480xf32>
    %23 = vector.extract_strided_slice %6 {offsets = [0, 0], sizes = [8, 32], strides = [1, 1]} : vector<8x512xf32> to vector<8x32xf32>
    %24 = tpu.concatenate %22, %23 in 1 : vector<8x480xf32>, vector<8x32xf32> -> vector<8x512xf32>
    %c0_9 = arith.constant 0 : index
    %c2 = arith.constant 2 : index
    %c0_10 = arith.constant 0 : index
    %25 = vector.load %arg2[%c0_9, %c2, %c0_10] : memref<3x3x512xf32, #tpu.memory_space<vmem>>, vector<1x1x512xf32>
    %26 = vector.shape_cast %25 : vector<1x1x512xf32> to vector<512xf32>
    %27 = vector.shape_cast %26 : vector<512xf32> to vector<1x512xf32>
    %28 = vector.broadcast %27 : vector<1x512xf32> to vector<8x512xf32>
    %29 = arith.mulf %24, %28 : vector<8x512xf32>
    %30 = arith.addf %21, %29 : vector<8x512xf32>
    %c0_11 = arith.constant 0 : index
    %c0_12 = arith.constant 0 : index
    %c0_13 = arith.constant 0 : index
    %31 = vector.load %arg1[%c0_11, %c0_12, %c0_13] : memref<1x16x512xf32, #tpu.memory_space<vmem>>, vector<1x8x512xf32>
    %32 = vector.shape_cast %31 : vector<1x8x512xf32> to vector<8x512xf32>
    %33 = vector.extract_strided_slice %32 {offsets = [0, 480], sizes = [8, 32], strides = [1, 1]} : vector<8x512xf32> to vector<8x32xf32>
    %34 = vector.extract_strided_slice %32 {offsets = [0, 0], sizes = [8, 480], strides = [1, 1]} : vector<8x512xf32> to vector<8x480xf32>
    %35 = tpu.concatenate %33, %34 in 1 : vector<8x32xf32>, vector<8x480xf32> -> vector<8x512xf32>
    %c1_14 = arith.constant 1 : index
    %c0_15 = arith.constant 0 : index
    %c0_16 = arith.constant 0 : index
    %36 = vector.load %arg2[%c1_14, %c0_15, %c0_16] : memref<3x3x512xf32, #tpu.memory_space<vmem>>, vector<1x1x512xf32>
    %37 = vector.shape_cast %36 : vector<1x1x512xf32> to vector<512xf32>
    %38 = vector.shape_cast %37 : vector<512xf32> to vector<1x512xf32>
    %39 = vector.broadcast %38 : vector<1x512xf32> to vector<8x512xf32>
    %40 = arith.mulf %35, %39 : vector<8x512xf32>
    %41 = arith.addf %30, %40 : vector<8x512xf32>
    %c1_17 = arith.constant 1 : index
    %c1_18 = arith.constant 1 : index
    %c0_19 = arith.constant 0 : index
    %42 = vector.load %arg2[%c1_17, %c1_18, %c0_19] : memref<3x3x512xf32, #tpu.memory_space<vmem>>, vector<1x1x512xf32>
    %43 = vector.shape_cast %42 : vector<1x1x512xf32> to vector<512xf32>
    %44 = vector.shape_cast %43 : vector<512xf32> to vector<1x512xf32>
    %45 = vector.broadcast %44 : vector<1x512xf32> to vector<8x512xf32>
    %46 = arith.mulf %32, %45 : vector<8x512xf32>
    %47 = arith.addf %41, %46 : vector<8x512xf32>
    %48 = vector.extract_strided_slice %32 {offsets = [0, 32], sizes = [8, 480], strides = [1, 1]} : vector<8x512xf32> to vector<8x480xf32>
    %49 = vector.extract_strided_slice %32 {offsets = [0, 0], sizes = [8, 32], strides = [1, 1]} : vector<8x512xf32> to vector<8x32xf32>
    %50 = tpu.concatenate %48, %49 in 1 : vector<8x480xf32>, vector<8x32xf32> -> vector<8x512xf32>
    %c1_20 = arith.constant 1 : index
    %c2_21 = arith.constant 2 : index
    %c0_22 = arith.constant 0 : index
    %51 = vector.load %arg2[%c1_20, %c2_21, %c0_22] : memref<3x3x512xf32, #tpu.memory_space<vmem>>, vector<1x1x512xf32>
    %52 = vector.shape_cast %51 : vector<1x1x512xf32> to vector<512xf32>
    %53 = vector.shape_cast %52 : vector<512xf32> to vector<1x512xf32>
    %54 = vector.broadcast %53 : vector<1x512xf32> to vector<8x512xf32>
    %55 = arith.mulf %50, %54 : vector<8x512xf32>
    %56 = arith.addf %47, %55 : vector<8x512xf32>
    %c0_23 = arith.constant 0 : index
    %c1_24 = arith.constant 1 : index
    %c0_25 = arith.constant 0 : index
    %57 = vector.load %arg1[%c0_23, %c1_24, %c0_25] : memref<1x16x512xf32, #tpu.memory_space<vmem>>, vector<1x8x512xf32>
    %58 = vector.shape_cast %57 : vector<1x8x512xf32> to vector<8x512xf32>
    %59 = vector.extract_strided_slice %58 {offsets = [0, 480], sizes = [8, 32], strides = [1, 1]} : vector<8x512xf32> to vector<8x32xf32>
    %60 = vector.extract_strided_slice %58 {offsets = [0, 0], sizes = [8, 480], strides = [1, 1]} : vector<8x512xf32> to vector<8x480xf32>
    %61 = tpu.concatenate %59, %60 in 1 : vector<8x32xf32>, vector<8x480xf32> -> vector<8x512xf32>
    %c2_26 = arith.constant 2 : index
    %c0_27 = arith.constant 0 : index
    %c0_28 = arith.constant 0 : index
    %62 = vector.load %arg2[%c2_26, %c0_27, %c0_28] : memref<3x3x512xf32, #tpu.memory_space<vmem>>, vector<1x1x512xf32>
    %63 = vector.shape_cast %62 : vector<1x1x512xf32> to vector<512xf32>
    %64 = vector.shape_cast %63 : vector<512xf32> to vector<1x512xf32>
    %65 = vector.broadcast %64 : vector<1x512xf32> to vector<8x512xf32>
    %66 = arith.mulf %61, %65 : vector<8x512xf32>
    %67 = arith.addf %56, %66 : vector<8x512xf32>
    %c2_29 = arith.constant 2 : index
    %c1_30 = arith.constant 1 : index
    %c0_31 = arith.constant 0 : index
    %68 = vector.load %arg2[%c2_29, %c1_30, %c0_31] : memref<3x3x512xf32, #tpu.memory_space<vmem>>, vector<1x1x512xf32>
    %69 = vector.shape_cast %68 : vector<1x1x512xf32> to vector<512xf32>
    %70 = vector.shape_cast %69 : vector<512xf32> to vector<1x512xf32>
    %71 = vector.broadcast %70 : vector<1x512xf32> to vector<8x512xf32>
    %72 = arith.mulf %58, %71 : vector<8x512xf32>
    %73 = arith.addf %67, %72 : vector<8x512xf32>
    %74 = vector.extract_strided_slice %58 {offsets = [0, 32], sizes = [8, 480], strides = [1, 1]} : vector<8x512xf32> to vector<8x480xf32>
    %75 = vector.extract_strided_slice %58 {offsets = [0, 0], sizes = [8, 32], strides = [1, 1]} : vector<8x512xf32> to vector<8x32xf32>
    %76 = tpu.concatenate %74, %75 in 1 : vector<8x480xf32>, vector<8x32xf32> -> vector<8x512xf32>
    %c2_32 = arith.constant 2 : index
    %c2_33 = arith.constant 2 : index
    %c0_34 = arith.constant 0 : index
    %77 = vector.load %arg2[%c2_32, %c2_33, %c0_34] : memref<3x3x512xf32, #tpu.memory_space<vmem>>, vector<1x1x512xf32>
    %78 = vector.shape_cast %77 : vector<1x1x512xf32> to vector<512xf32>
    %79 = vector.shape_cast %78 : vector<512xf32> to vector<1x512xf32>
    %80 = vector.broadcast %79 : vector<1x512xf32> to vector<8x512xf32>
    %81 = arith.mulf %76, %80 : vector<8x512xf32>
    %82 = arith.addf %73, %81 : vector<8x512xf32>
    %c0_35 = arith.constant 0 : index
    %c0_36 = arith.constant 0 : index
    %c0_37 = arith.constant 0 : index
    %83 = vector.load %arg4[%c0_35, %c0_36, %c0_37] : memref<1x16x512xf32, #tpu.memory_space<vmem>>, vector<1x8x512xf32>
    %84 = vector.shape_cast %83 : vector<1x8x512xf32> to vector<8x512xf32>
    %85 = vector.shape_cast %82 : vector<8x512xf32> to vector<1x8x512xf32>
    tpu.vector_store %arg4[%c0_35, %c0_36, %c0_37], %85 {strides = array<i32>} : memref<1x16x512xf32, #tpu.memory_space<vmem>>, vector<1x8x512xf32>,
    %86 = vector.shape_cast %0 : vector<1x512xf32> to vector<1x512xf32>
    %87 = vector.broadcast %86 : vector<1x512xf32> to vector<8x512xf32>
    %c0_38 = arith.constant 0 : index
    %c7 = arith.constant 7 : index
    %c0_39 = arith.constant 0 : index
    %88 = vector.load %arg1[%c0_38, %c7, %c0_39] : memref<1x16x512xf32, #tpu.memory_space<vmem>>, vector<1x8x512xf32>
    %89 = vector.shape_cast %88 : vector<1x8x512xf32> to vector<8x512xf32>
    %90 = vector.extract_strided_slice %89 {offsets = [0, 480], sizes = [8, 32], strides = [1, 1]} : vector<8x512xf32> to vector<8x32xf32>
    %91 = vector.extract_strided_slice %89 {offsets = [0, 0], sizes = [8, 480], strides = [1, 1]} : vector<8x512xf32> to vector<8x480xf32>
    %92 = tpu.concatenate %90, %91 in 1 : vector<8x32xf32>, vector<8x480xf32> -> vector<8x512xf32>
    %c0_40 = arith.constant 0 : index
    %c0_41 = arith.constant 0 : index
    %c0_42 = arith.constant 0 : index
    %93 = vector.load %arg2[%c0_40, %c0_41, %c0_42] : memref<3x3x512xf32, #tpu.memory_space<vmem>>, vector<1x1x512xf32>
    %94 = vector.shape_cast %93 : vector<1x1x512xf32> to vector<512xf32>
    %95 = vector.shape_cast %94 : vector<512xf32> to vector<1x512xf32>
    %96 = vector.broadcast %95 : vector<1x512xf32> to vector<8x512xf32>
    %97 = arith.mulf %92, %96 : vector<8x512xf32>
    %98 = arith.addf %87, %97 : vector<8x512xf32>
    %c0_43 = arith.constant 0 : index
    %c1_44 = arith.constant 1 : index
    %c0_45 = arith.constant 0 : index
    %99 = vector.load %arg2[%c0_43, %c1_44, %c0_45] : memref<3x3x512xf32, #tpu.memory_space<vmem>>, vector<1x1x512xf32>
    %100 = vector.shape_cast %99 : vector<1x1x512xf32> to vector<512xf32>
    %101 = vector.shape_cast %100 : vector<512xf32> to vector<1x512xf32>
    %102 = vector.broadcast %101 : vector<1x512xf32> to vector<8x512xf32>
    %103 = arith.mulf %89, %102 : vector<8x512xf32>
    %104 = arith.addf %98, %103 : vector<8x512xf32>
    %105 = vector.extract_strided_slice %89 {offsets = [0, 32], sizes = [8, 480], strides = [1, 1]} : vector<8x512xf32> to vector<8x480xf32>
    %106 = vector.extract_strided_slice %89 {offsets = [0, 0], sizes = [8, 32], strides = [1, 1]} : vector<8x512xf32> to vector<8x32xf32>
    %107 = tpu.concatenate %105, %106 in 1 : vector<8x480xf32>, vector<8x32xf32> -> vector<8x512xf32>
    %c0_46 = arith.constant 0 : index
    %c2_47 = arith.constant 2 : index
    %c0_48 = arith.constant 0 : index
    %108 = vector.load %arg2[%c0_46, %c2_47, %c0_48] : memref<3x3x512xf32, #tpu.memory_space<vmem>>, vector<1x1x512xf32>
    %109 = vector.shape_cast %108 : vector<1x1x512xf32> to vector<512xf32>
    %110 = vector.shape_cast %109 : vector<512xf32> to vector<1x512xf32>
    %111 = vector.broadcast %110 : vector<1x512xf32> to vector<8x512xf32>
    %112 = arith.mulf %107, %111 : vector<8x512xf32>
    %113 = arith.addf %104, %112 : vector<8x512xf32>
    %c0_49 = arith.constant 0 : index
    %c8 = arith.constant 8 : index
    %c0_50 = arith.constant 0 : index
    %114 = vector.load %arg1[%c0_49, %c8, %c0_50] : memref<1x16x512xf32, #tpu.memory_space<vmem>>, vector<1x8x512xf32>
    %115 = vector.shape_cast %114 : vector<1x8x512xf32> to vector<8x512xf32>
    %116 = vector.extract_strided_slice %115 {offsets = [0, 480], sizes = [8, 32], strides = [1, 1]} : vector<8x512xf32> to vector<8x32xf32>
    %117 = vector.extract_strided_slice %115 {offsets = [0, 0], sizes = [8, 480], strides = [1, 1]} : vector<8x512xf32> to vector<8x480xf32>
    %118 = tpu.concatenate %116, %117 in 1 : vector<8x32xf32>, vector<8x480xf32> -> vector<8x512xf32>
    %c1_51 = arith.constant 1 : index
    %c0_52 = arith.constant 0 : index
    %c0_53 = arith.constant 0 : index
    %119 = vector.load %arg2[%c1_51, %c0_52, %c0_53] : memref<3x3x512xf32, #tpu.memory_space<vmem>>, vector<1x1x512xf32>
    %120 = vector.shape_cast %119 : vector<1x1x512xf32> to vector<512xf32>
    %121 = vector.shape_cast %120 : vector<512xf32> to vector<1x512xf32>
    %122 = vector.broadcast %121 : vector<1x512xf32> to vector<8x512xf32>
    %123 = arith.mulf %118, %122 : vector<8x512xf32>
    %124 = arith.addf %113, %123 : vector<8x512xf32>
    %c1_54 = arith.constant 1 : index
    %c1_55 = arith.constant 1 : index
    %c0_56 = arith.constant 0 : index
    %125 = vector.load %arg2[%c1_54, %c1_55, %c0_56] : memref<3x3x512xf32, #tpu.memory_space<vmem>>, vector<1x1x512xf32>
    %126 = vector.shape_cast %125 : vector<1x1x512xf32> to vector<512xf32>
    %127 = vector.shape_cast %126 : vector<512xf32> to vector<1x512xf32>
    %128 = vector.broadcast %127 : vector<1x512xf32> to vector<8x512xf32>
    %129 = arith.mulf %115, %128 : vector<8x512xf32>
    %130 = arith.addf %124, %129 : vector<8x512xf32>
    %131 = vector.extract_strided_slice %115 {offsets = [0, 32], sizes = [8, 480], strides = [1, 1]} : vector<8x512xf32> to vector<8x480xf32>
    %132 = vector.extract_strided_slice %115 {offsets = [0, 0], sizes = [8, 32], strides = [1, 1]} : vector<8x512xf32> to vector<8x32xf32>
    %133 = tpu.concatenate %131, %132 in 1 : vector<8x480xf32>, vector<8x32xf32> -> vector<8x512xf32>
    %c1_57 = arith.constant 1 : index
    %c2_58 = arith.constant 2 : index
    %c0_59 = arith.constant 0 : index
    %134 = vector.load %arg2[%c1_57, %c2_58, %c0_59] : memref<3x3x512xf32, #tpu.memory_space<vmem>>, vector<1x1x512xf32>
    %135 = vector.shape_cast %134 : vector<1x1x512xf32> to vector<512xf32>
    %136 = vector.shape_cast %135 : vector<512xf32> to vector<1x512xf32>
    %137 = vector.broadcast %136 : vector<1x512xf32> to vector<8x512xf32>
    %138 = arith.mulf %133, %137 : vector<8x512xf32>
    %139 = arith.addf %130, %138 : vector<8x512xf32>
    %c0_60 = arith.constant 0 : index
    %c9 = arith.constant 9 : index
    %c0_61 = arith.constant 0 : index
    %140 = vector.load %arg1[%c0_60, %c9, %c0_61] : memref<1x16x512xf32, #tpu.memory_space<vmem>>, vector<1x7x512xf32>
    %141 = vector.shape_cast %140 : vector<1x7x512xf32> to vector<7x512xf32>
    %cst_62 = arith.constant 0.000000e+00 : f32
    %142 = vector.broadcast %cst_62 : f32 to vector<1x512xf32>
    %143 = tpu.concatenate %141, %142 in 0 : vector<7x512xf32>, vector<1x512xf32> -> vector<8x512xf32>
    %144 = vector.extract_strided_slice %143 {offsets = [0, 480], sizes = [8, 32], strides = [1, 1]} : vector<8x512xf32> to vector<8x32xf32>
    %145 = vector.extract_strided_slice %143 {offsets = [0, 0], sizes = [8, 480], strides = [1, 1]} : vector<8x512xf32> to vector<8x480xf32>
    %146 = tpu.concatenate %144, %145 in 1 : vector<8x32xf32>, vector<8x480xf32> -> vector<8x512xf32>
    %c2_63 = arith.constant 2 : index
    %c0_64 = arith.constant 0 : index
    %c0_65 = arith.constant 0 : index
    %147 = vector.load %arg2[%c2_63, %c0_64, %c0_65] : memref<3x3x512xf32, #tpu.memory_space<vmem>>, vector<1x1x512xf32>
    %148 = vector.shape_cast %147 : vector<1x1x512xf32> to vector<512xf32>
    %149 = vector.shape_cast %148 : vector<512xf32> to vector<1x512xf32>
    %150 = vector.broadcast %149 : vector<1x512xf32> to vector<8x512xf32>
    %151 = arith.mulf %146, %150 : vector<8x512xf32>
    %152 = arith.addf %139, %151 : vector<8x512xf32>
    %c2_66 = arith.constant 2 : index
    %c1_67 = arith.constant 1 : index
    %c0_68 = arith.constant 0 : index
    %153 = vector.load %arg2[%c2_66, %c1_67, %c0_68] : memref<3x3x512xf32, #tpu.memory_space<vmem>>, vector<1x1x512xf32>
    %154 = vector.shape_cast %153 : vector<1x1x512xf32> to vector<512xf32>
    %155 = vector.shape_cast %154 : vector<512xf32> to vector<1x512xf32>
    %156 = vector.broadcast %155 : vector<1x512xf32> to vector<8x512xf32>
    %157 = arith.mulf %143, %156 : vector<8x512xf32>
    %158 = arith.addf %152, %157 : vector<8x512xf32>
    %159 = vector.extract_strided_slice %143 {offsets = [0, 32], sizes = [8, 480], strides = [1, 1]} : vector<8x512xf32> to vector<8x480xf32>
    %160 = vector.extract_strided_slice %143 {offsets = [0, 0], sizes = [8, 32], strides = [1, 1]} : vector<8x512xf32> to vector<8x32xf32>
    %161 = tpu.concatenate %159, %160 in 1 : vector<8x480xf32>, vector<8x32xf32> -> vector<8x512xf32>
    %c2_69 = arith.constant 2 : index
    %c2_70 = arith.constant 2 : index
    %c0_71 = arith.constant 0 : index
    %162 = vector.load %arg2[%c2_69, %c2_70, %c0_71] : memref<3x3x512xf32, #tpu.memory_space<vmem>>, vector<1x1x512xf32>
    %163 = vector.shape_cast %162 : vector<1x1x512xf32> to vector<512xf32>
    %164 = vector.shape_cast %163 : vector<512xf32> to vector<1x512xf32>
    %165 = vector.broadcast %164 : vector<1x512xf32> to vector<8x512xf32>
    %166 = arith.mulf %161, %165 : vector<8x512xf32>
    %167 = arith.addf %158, %166 : vector<8x512xf32>
    %c0_72 = arith.constant 0 : index
    %c8_73 = arith.constant 8 : index
    %c0_74 = arith.constant 0 : index
    %168 = vector.load %arg4[%c0_72, %c8_73, %c0_74] : memref<1x16x512xf32, #tpu.memory_space<vmem>>, vector<1x8x512xf32>
    %169 = vector.shape_cast %168 : vector<1x8x512xf32> to vector<8x512xf32>
    %170 = vector.shape_cast %167 : vector<8x512xf32> to vector<1x8x512xf32>
    tpu.vector_store %arg4[%c0_72, %c8_73, %c0_74], %170 {strides = array<i32>} : memref<1x16x512xf32, #tpu.memory_space<vmem>>, vector<1x8x512xf32>,
    return
  }
  func.func @transform_0(%arg0: i32) -> (i32, i32, i32) {
    %c0_i32 = arith.constant 0 : i32
    %c0_i32_0 = arith.constant 0 : i32
    %c0_i32_1 = arith.constant 0 : i32
    return %arg0, %c0_i32, %c0_i32_0 : i32, i32, i32
  }
  func.func @transform_1(%arg0: i32) -> (i32, i32, i32) {
    %c0_i32 = arith.constant 0 : i32
    %c0_i32_0 = arith.constant 0 : i32
    %c0_i32_1 = arith.constant 0 : i32
    %c0_i32_2 = arith.constant 0 : i32
    return %c0_i32, %c0_i32_0, %c0_i32_1 : i32, i32, i32
  }
  func.func @transform_2(%arg0: i32) -> (i32, i32) {
    %c0_i32 = arith.constant 0 : i32
    %c0_i32_0 = arith.constant 0 : i32
    %c0_i32_1 = arith.constant 0 : i32
    return %c0_i32, %c0_i32_0 : i32, i32
  }
  func.func @transform_3(%arg0: i32) -> (i32, i32, i32) {
    %c0_i32 = arith.constant 0 : i32
    %c0_i32_0 = arith.constant 0 : i32
    %c0_i32_1 = arith.constant 0 : i32
    return %arg0, %c0_i32, %c0_i32_0 : i32, i32, i32
  }
}

</mosaic_0001>

<bundles_post_ra>
// kernel: tpu_custom_call.1
= control target key start
LH: loop header
LB: loop body
LE: loop exit
PB: predicated region body
PF: predicated region fallthrough
CT: control target
= control target key end

     0   :  { %6 = vsyncpa [#allocation3], 0  ;;  %s118_s0 = inlined_call_operand.hbm [shape: f32[8,128], index: 0, kind: input, shape index: {}]   ;;  %s119_s1 = inlined_call_operand.hbm [shape: f32[8,128], index: 1, kind: output, shape index: {}]  }
   0x1   :  { %7 = vsyncpa [#allocation4], 0  ;;  %s13_s8 = sshll.u32 %s118_s0, 4  ;;  %s99_s9 = smov [#allocation2]   ;;  %s14_s8 = int_to_ptr.hbm [resolvable:$true] %s13_s8 }
   0x2   :  { %s15_s10 = sshll.u32 %s99_s9, 4  ;;  %s16_s10 = int_to_ptr.vmem [resolvable:$true] %s15_s10 }
   0x3   :  { %18 = dma.hbm_to_vmem [thread:$0]  %s14_s8, 128, %s16_s10, [#allocation3]  }
   0x4   :  { %95 = dma.done.wait [#allocation3], 128  }
   0x5   :  { %96 = vsyncadd [#allocation3], 4294967168  ;;  %v23_v0 = vld [vmem:[#allocation2] sm:$0xff]  ;;  %s100_s11 = smov 1   ;;  %s101_s12 = smov [#allocation5]  }
   0x6   :  { %24 = vrot.lane.b32.xlu0 %v23_v0, %s100_s11  ;;  %s32_s13 = sshll.u32 %s101_s12, 4  ;;  %s34_s16 = sshll.u32 %s119_s1, 4  ;;  %s33_s13 = int_to_ptr.vmem [resolvable:$true] %s32_s13  ;;  %s35_s16 = int_to_ptr.hbm [resolvable:$true] %s34_s16 }
  0x78   :  { %v25_v1 = vpop.permute.xlu0 %24 }
  0x79   :  { %26 = vst [vmem:[#allocation5] sm:$0xff] %v25_v1 }
  0x7a   :  { %37 = dma.vmem_to_hbm [thread:$0]  %s33_s13, 128, %s35_s16, [#allocation4]  }
  0x7b   :  { %97 = dma.done.wait [#allocation4], 128  }
  0x7c   :  { %98 = vsyncadd [#allocation4], 4294967168 }
  0x7d   :  { %42 = vsyncpa [#allocation3], 1 }
  0x7e   :  { %43 = vsyncpa [#allocation4], 1 }

// kernel: tpu_custom_call.1
= control target key start
LH: loop header
LB: loop body
LE: loop exit
PB: predicated region body
PF: predicated region fallthrough
CT: control target
= control target key end

     0   :  { %8 = vsyncpa [#allocation3], 0  ;;  %s2270_s0 = inlined_call_operand.hbm [shape: f32[2,16,512], index: 0, kind: input, shape index: {}]   ;;  %s2271_s1 = inlined_call_operand.hbm [shape: f32[3,3,512], index: 1, kind: input, shape index: {}]   ;;  %s2272_s2 = inlined_call_operand.hbm [shape: f32[1,512], index: 2, kind: input, shape index: {}]   ;;  %s2273_s3 = inlined_call_operand.hbm [shape: f32[2,16,512], index: 3, kind: output, shape index: {}]  }
   0x1   :  { %10 = vsyncpa [#allocation3 + $0x1], 0 }
   0x2   :  { %11 = vsyncpa [#allocation6], 0 }
   0x3   :  { %12 = vsyncpa [#allocation4], 0 }
   0x4   :  { %14 = vsyncpa [#allocation4 + $0x1], 0  ;;  %s1569_s12 = smov 0   ;;  %s1571_s13 = smov 0  }
   0x5   :  { %s1573_s14 = smov 0   ;;  %s1575_s15 = smov 0  }
   0x6 LB: > { %s1590_s16 = sadd.s32 4294967295, %s1538_s15   ;;  %s1284_s17 = sadd.s32 4294967294, %s1538_s15   ;;  %s1538_s15 = sphi %s1575_s15, %s2283_s15   ;;  %s1534_s14 = sphi %s1573_s14, %s2282_s14   ;;  %s1530_s13 = sphi %s1571_s13, %s2281_s13   ;;  %s1526_s12 = sphi %s1569_s12, %s2280_s12  }
   0x7   : > { %p40_p0 = scmp.ne.s32.totalorder %s1530_s13, %s1526_s12  ;;  %p41_p1 = scmp.eq.s32.totalorder %s1590_s16, 0 }
   0x8   : > { %p106_p2 = scmp.eq.s32.totalorder %s1590_s16, 1  ;;  %p112_p3 = scmp.eq.s32.totalorder %s1284_s17, 1 }
   0x9   : > { %p1599_p4 = por %p41_p1, %p40_p0  ;;  %p1285_p5 = scmp.ge.s32.totalorder %s1538_s15, 1 }
   0xa   : > { %p1604_p6 = por %p112_p3, %p40_p0  ;;  %p119_p7 = scmp.lt.s32.totalorder %s1538_s15, 3 }
   0xb   : > { %s130_s22 = sshll.u32 %s2271_s1, 4  ;;  %s1540_s24 = smov [#allocation5]   ;;  %s131_s22 = int_to_ptr.hbm [resolvable:$true] %s130_s22 }
   0xc   : > { %p1612_p8 = pnand %p1285_p5, %p119_p7  ;;  %s132_s25 = sshll.u32 %s1540_s24, 4  ;;  %s133_s25 = int_to_ptr.vmem [resolvable:$true] %s132_s25 }
   0xd   : > { %s145_s28 = sshll.u32 %s2272_s2, 4  ;;  %s1541_s29 = smov 256   ;;  %s146_s28 = int_to_ptr.hbm [resolvable:$true] %s145_s28 }
   0xe   : > { %p1316_p9 = pneg %p1612_p8  ;;  %s1542_s30 = smov 16  }
   0xf   : > { %s1543_s4 = smov [#allocation7]   ;;  %s1625_s6 = sadd.s32 1, %s1538_s15  }
  0x10   : > { %p1317_p10 = pnand %p1316_p9, %p41_p1  ;;  %s147_s5 = sshll.u32 %s1543_s4, 4  ;;  %s148_s5 = int_to_ptr.vmem [resolvable:$true] %s147_s5 }
  0x11   : > { %s27_s7 = sadd.s32 1, %s1534_s14  ;;  %s24_s8 = ssub.s32 %s1538_s15, %s1625_s6 }
  0x12   : > { %1319 = dma.hbm_to_vmem [thread:$0]  (!%p1317_p10), %s131_s22, 768, %s133_s25, [#allocation6], %s1541_s29, %s1541_s29, %s1542_s30  }
  0x13   : > { %1322 = dma.hbm_to_vmem [thread:$0]  (!%p1317_p10), %s146_s28, 64, %s148_s5, [#allocation6]  }
  0x14   : > { %p34_p12 = scmp.ne.s32.totalorder %s1534_s14, %s1530_s13  ;;  %p25_p13 = scmp.eq.s32.totalorder %s24_s8, 0 }
  0x15   : > { %p35_p0 = scmp.eq.s32.totalorder %s1538_s15, 0  ;;  %p1333_p5 = scmp.lt.s32.totalorder %s1538_s15, 2 }
  0x16   : > { %p1635_p3 = por %p106_p2, %p34_p12  ;;  %s158_s11 = sand.u32 1, %s1534_s14  }
  0x17   : > { %s1641_s10 = scalar_select %p25_p13, %s1534_s14, %s27_s7  }
  0x18   : > { %p36_p7 = por %p35_p0, %p34_p12  ;;  %s1289_s17 = sshll.u32 %s158_s11, 6 }
  0x19   : > { %s1302_s20 = sshll.u32 %s1538_s15, 6  ;;  %s162_s25 = scalar_lea.vmem [#allocation2], %s1289_s17 }
  0x1a   : > { %s167_s24 = scalar_lea.hbm %s2270_s0, %s1302_s20  ;;  %s170_s26 = sshll.u32 %s162_s25, 4  ;;  %s171_s26 = int_to_ptr.vmem [resolvable:$true] %s170_s26 }
  0x1b   : > { %s168_s27 = sshll.u32 %s167_s24, 4  ;;  %p1648_p2 = pnand %p1333_p5, %p36_p7  ;;  %s169_s27 = int_to_ptr.hbm [resolvable:$true] %s168_s27 }
  0x1c   : > { %s159_s29 = scalar_lea.sflag [#allocation3], %s158_s11  ;;  %s1438_s30 = sshra.s32 %s169_s27, 4  ;;  %s1439_s30 = int_to_ptr.hbm [resolvable:$true] %s1438_s30 }
  0x1d   : > { %s1440_s4 = scalar_lea.hbm %s1439_s30, 64  ;;  %p1442_p10 = pneg %p1648_p2 }
  0x1e   : > { %p1441_p9 = scmp.ne.s32.totalorder %s1439_s30, %s1440_s4  ;;  %s1445_s8 = scalar_lea.hbm %s2270_s0, 128 }
  0x1f   : > { %p1446_p0 = scmp.lt.s32.totalorder %s1439_s30, %s2270_s0  ;;  %p1447_p5 = scmp.lt.s32.totalorder %s1445_s8, %s1440_s4 }
  0x20   : > { %p1443_p12 = pnand %p1442_p10, %p1441_p9 }
  0x21   : > { %p1448_p7 = por %p1447_p5, %p1446_p0 }
  0x22   : > { %p1444_p13 = pneg %p1443_p12 }
  0x24   : > { %p1449_p11 = pnand %p1448_p7, %p1444_p13 }
  0x26   : > { %1452 = shalt.err (!%p1449_p11)
}
  0x27   : > { %s1544_s11 = smov 512   ;;  %s1545_s21 = smov 32  }
  0x28   : > { %1326 = dma.hbm_to_vmem [thread:$0]  (!%p1648_p2), %s169_s27, 1024, %s171_s26, %s159_s29, %s1544_s11, %s1544_s11, %s1545_s21  }
  0x29   : > { %182 = sbr.rel (%p1612_p8) target bundleno = 352 (0x160), region = 32  ;;  %s1665_s22 = sand.u32 (!%p1612_p8), 1, %s1530_s13  }
  0x2a   : > { %s1293_s24 = sshll.u32 (!%p1612_p8), %s1665_s22, 6  ;;  %s185_s25 = scalar_lea.sflag (!%p1612_p8), [#allocation3], %s1665_s22 }
  0x2b   : > { %s1671_s30 = scalar_lea.vmem (!%p1612_p8), [#allocation2], %s1293_s24 }
  0x2e   : > { %1513 = dma.done.wait (%p1599_p4), %s185_s25, 1024  }
  0x2f   : > { %1515 = vsyncadd (%p1599_p4), %s185_s25, 4294966272 }
  0x30   : > { %1517 = dma.done.wait (%p41_p1), [#allocation6], 832  }
  0x31   : > { %1519 = vsyncadd (%p41_p1), [#allocation6], 4294966464  ;;  %v235_v0 = vld [vmem:[%s1671_s30 + $0x18] sm:$0x7f]  ;;  %vm248_vm0 = vcmask 1040384   ;;  %s1546_s18 = smov 32  }
  0x32   : > { %v243_v1 = vrot.slane %v235_v0, 7  ;;  %v233_v2 = vld [vmem:[%s1671_s30 + $0x8] sm:$0x7f]  ;;  %v232_v4 = vld [vmem:[%s1671_s30] sm:$0x7f]  ;;  %s1547_s23 = smov 96  }
  0x33   : > { %v241_v3 = vrot.slane %v233_v2, 7  ;;  %v234_v6 = vld [vmem:[%s1671_s30 + $0x10] sm:$0x7f]  ;;  %v240_v7 = vrot.slane %v232_v4, 7  ;;  %v449_v14 = vld [vmem:[%s1671_s30 + $0x8] sm:$0xfe] }
  0x34   : > { %v1685_v5 = vsel %vm248_vm0, 0.0, %v243_v1  ;;  %v242_v10 = vrot.slane %v234_v6, 7  ;;  %v1707_v12 = vld [vmem:[#allocation5 + $0x21] ss:$4 sm:$0xf]  ;;  %v1714_v16 = vld [vmem:[%s1671_s30 + $0x18] sm:$0xff] }
  0x35   : > { %254 = vrot.lane.b32.xlu0 %v1685_v5, %s1546_s18  ;;  %v1691_v8 = vsel %vm248_vm0, 0.0, %v241_v3  ;;  %v1696_v9 = vsel %vm248_vm0, 0.0, %v240_v7  ;;  %v550_v13 = vperm.slane %v1707_v12, 1  ;;  %v549_v17 = vperm.slane %v1707_v12, 0  ;;  %v453_v18 = vld [vmem:[%s1671_s30 + $0x28] sm:$0x1] }
  0x36   : > { %262 = vrot.lane.b32.xlu1 %v1691_v8, %s1546_s18  ;;  %312 = vrot.lane.b32.xlu2 %v1696_v9, %s1547_s23  ;;  %v1701_v11 = vsel %vm248_vm0, 0.0, %v242_v10  ;;  %v448_v21 = vld [vmem:[%s1671_s30] sm:$0xfe]  ;;  %vm525_vm1 = vcmask 1046528   ;;  %v1729_v25 = vld [vmem:[%s1671_s30 + $0x8] sm:$0xff]  ;;  %v551_v30 = vperm.slane %v1707_v12, 2 }
  0x37   : > { %v558_v15 = vmul.f32 %v550_v13, %v449_v14  ;;  %v562_v20 = vmul.f32 %v550_v13, %v453_v18  ;;  %v1726_v23 = vld [vmem:[%s1671_s30] sm:$0xff]  ;;  %v557_v24 = vmul.f32 %v549_v17, %v448_v21  ;;  %v1735_v27 = vld [vmem:[%s1671_s30 + $0x10] sm:$0xff]  ;;  %v1760_v41 = vld [vmem:[%s1671_s30 + $0x18] sm:$0xfe]  ;;  %vm266_vm2 = vcmask 261120   ;;  %s2032_s26 = scalar_lea.vmem [#allocation8], %s1293_s24 }
  0x38   : > { %v452_v28 = vld [vmem:[%s1671_s30 + $0x20] sm:$0x1]  ;;  %v450_v33 = vld [vmem:[%s1671_s30 + $0x10] sm:$0xfe]  ;;  %v454_v36 = vld [vmem:[%s1671_s30 + $0x30] sm:$0x1] }
  0x39   : > { %v576_v19 = vrot.slane %v558_v15, 1  ;;  %v577_v22 = vrot.slane %v562_v20, 1  ;;  %v573_v29 = vrot.slane %v557_v24, 1  ;;  %v561_v31 = vmul.f32 %v549_v17, %v452_v28  ;;  %v1763_v42 = vld [vmem:[%s1671_s30 + $0x38] sm:$0x1]  ;;  %s1303_s27 = sshll.u32 %s1590_s16, 6 }
  0x3a   : > { %v559_v34 = vmul.f32 %v551_v30, %v450_v33  ;;  %v563_v38 = vmul.f32 %v551_v30, %v454_v36  ;;  %v1785_v43 = vld [vmem:[%s1671_s30 + $0x18] sm:$0x80]  ;;  %v1793_v44 = vld [vmem:[%s1671_s30 + $0x38] sm:$0x7f]  ;;  %v1796_v45 = vld [vmem:[%s1671_s30] sm:$0x80]  ;;  %s1184_s4 = scalar_lea.hbm %s2273_s3, %s1303_s27 }
  0x3b   : > { %v1732_v26 = vsel %vm525_vm1, %v576_v19, %v577_v22  ;;  %v574_v32 = vrot.slane %v561_v31, 1  ;;  %v1799_v46 = vld [vmem:[%s1671_s30 + $0x8] sm:$0x80]  ;;  %v1810_v48 = vld [vmem:[%s1671_s30 + $0x10] sm:$0x80]  ;;  %v1867_v24 = vld [vmem:[%s1671_s30 + $0x38] sm:$0xff] }
  0x3c   : > { %v579_v37 = vrot.slane %v559_v34, 1  ;;  %v580_v39 = vrot.slane %v563_v38, 1  ;;  %v1813_v49 = vld [vmem:[%s1671_s30 + $0x20] sm:$0x7f]  ;;  %v1816_v50 = vld [vmem:[%s1671_s30 + $0x28] sm:$0x7f] }
  0x3d   : > { %260 = vrot.lane.b32.xlu0 %v1696_v9, %s1546_s18  ;;  %v1747_v35 = vsel %vm525_vm1, %v573_v29, %v574_v32  ;;  %v1827_v52 = vld [vmem:[%s1671_s30 + $0x30] sm:$0x7f]  ;;  %v294_v55 = vld [vmem:[#allocation5 + $0x1] ss:$4 sm:$0xf]  ;;  %vm320_vm3 = vcmask 785408  }
  0x3e   : > { %264 = vrot.lane.b32.xlu1 %v1701_v11, %s1546_s18  ;;  %314 = vrot.lane.b32.xlu2 %v1691_v8, %s1547_s23  ;;  %v1757_v40 = vsel %vm525_vm1, %v579_v37, %v580_v39  ;;  %v275_v58 = vld [vmem:[#allocation5] ss:$4 sm:$0xf]  ;;  %v299_v59 = vperm.slane %v294_v55, 3  ;;  %v297_v60 = vperm.slane %v294_v55, 1  ;;  %v298_v63 = vperm.slane %v294_v55, 2 }
  0x3f   : > { %v222_v61 = vld [vmem:[#allocation7] sm:$0xf]  ;;  %v278_v62 = vperm.slane %v275_v58, 1  ;;  %v279_v0 = vperm.slane %v275_v58, 2  ;;  %v280_v1 = vperm.slane %v275_v58, 3  ;;  %v277_v17 = vperm.slane %v275_v58, 0 }
  0x40   : > { %v307_v2 = vmul.f32 %v299_v59, %v1685_v5  ;;  %v1850_v4 = vperm.slane %v222_v61, 1  ;;  %v305_v6 = vmul.f32 %v297_v60, %v1691_v8  ;;  %v1855_v10 = vperm.slane %v222_v61, 2  ;;  %v1873_v30 = vld [vmem:[%s1671_s30 + $0x20] sm:$0xff]  ;;  %v394_v31 = vld [vmem:[#allocation5 + $0x11] ss:$4 sm:$0xf] }
  0x41   : > { %v1857_v13 = vperm.slane %v222_v61, 3  ;;  %v306_v20 = vmul.f32 %v298_v63, %v1701_v11  ;;  %v1878_v34 = vld [vmem:[%s1671_s30 + $0x28] sm:$0xff]  ;;  %v1880_v37 = vperm.slane %v222_v61, 0  ;;  %v399_v61 = vperm.slane %v394_v31, 3  ;;  %s1185_s16 = sshll.u32 %s2032_s26, 4  ;;  %s1187_s5 = sshll.u32 %s1184_s4, 4  ;;  %s1186_s16 = int_to_ptr.vmem [resolvable:$true] %s1185_s16  ;;  %s1188_s5 = int_to_ptr.hbm [resolvable:$true] %s1187_s5 }
  0x42   : > { %s1173_s7 = scalar_lea.sflag [#allocation4], %s1665_s22  ;;  %s1482_s8 = sshra.s32 %s1188_s5, 4  ;;  %s1483_s8 = int_to_ptr.hbm [resolvable:$true] %s1482_s8 }
  0x43   : > { %s1484_s17 = scalar_lea.hbm %s1483_s8, 64  ;;  %s1488_s21 = scalar_lea.hbm %s2273_s3, 128 }
  0x44   : > { %p1485_p1 = scmp.ne.s32.totalorder %s1483_s8, %s1484_s17  ;;  %p1489_p11 = scmp.lt.s32.totalorder %s1483_s8, %s2273_s3 }
  0x45   : > { %316 = vrot.lane.b32.xlu0 %v1701_v11, %s1547_s23  ;;  %v296_v11 = vperm.slane %v294_v55, 0  ;;  %p1490_p2 = scmp.lt.s32.totalorder %s1488_s21, %s1484_s17 }
  0x46   : > { %318 = vrot.lane.b32.xlu1 %v1685_v5, %s1547_s23  ;;  %354 = vrot.lane.b32.xlu2 %v1714_v16, %s1546_s18  ;;  %p1486_p4 = pnand %p1485_p1, %p1635_p3 }
  0x47   : > { %v304_v63 = vmul.f32 %v296_v11, %v1696_v9  ;;  %p1491_p9 = por %p1490_p2, %p1489_p11 }
  0x48   : > { %p1487_p8 = pneg %p1486_p4 }
  0x4a   : > { %p1492_p10 = pnand %p1491_p9, %p1487_p8 }
  0x4d   : > { %360 = vrot.lane.b32.xlu0 %v1726_v23, %s1546_s18 }
  0x4e   : > { %362 = vrot.lane.b32.xlu1 %v1729_v25, %s1546_s18  ;;  %364 = vrot.lane.b32.xlu2 %v1735_v27, %s1546_s18 }
  0x55   : > { %412 = vrot.lane.b32.xlu0 %v1726_v23, %s1547_s23 }
  0x56   : > { %414 = vrot.lane.b32.xlu1 %v1729_v25, %s1547_s23  ;;  %416 = vrot.lane.b32.xlu2 %v1735_v27, %s1547_s23 }
  0x5d   : > { %418 = vrot.lane.b32.xlu0 %v1714_v16, %s1547_s23 }
  0x5e   : > { %458 = vrot.lane.b32.xlu1 %v1760_v41, %s1546_s18  ;;  %460 = vrot.lane.b32.xlu2 %v1763_v42, %s1546_s18 }
  0x65   : > { %470 = vrot.lane.b32.xlu0 %v448_v21, %s1546_s18 }
  0x66   : > { %472 = vrot.lane.b32.xlu1 %v449_v14, %s1546_s18  ;;  %474 = vrot.lane.b32.xlu2 %v450_v33, %s1546_s18 }
  0x6d   : > { %476 = vrot.lane.b32.xlu0 %v452_v28, %s1546_s18 }
  0x6e   : > { %478 = vrot.lane.b32.xlu1 %v453_v18, %s1546_s18  ;;  %480 = vrot.lane.b32.xlu2 %v454_v36, %s1546_s18 }
  0x75   : > { %593 = vrot.lane.b32.xlu0 %v448_v21, %s1547_s23 }
  0x76   : > { %595 = vrot.lane.b32.xlu1 %v449_v14, %s1547_s23  ;;  %597 = vrot.lane.b32.xlu2 %v450_v33, %s1547_s23 }
  0x7d   : > { %599 = vrot.lane.b32.xlu0 %v1760_v41, %s1547_s23 }
  0x7e   : > { %601 = vrot.lane.b32.xlu1 %v452_v28, %s1547_s23  ;;  %603 = vrot.lane.b32.xlu2 %v453_v18, %s1547_s23  ;;  %v1869_v28 = vld [vmem:[#allocation5 + $0x10] ss:$4 sm:$0xf] }
  0x7f   : > { %v377_v11 = vperm.slane %v1869_v28, 0 }
  0x85   : > { %605 = vrot.lane.b32.xlu0 %v454_v36, %s1547_s23  ;;  %v331_v36 = vld [vmem:[#allocation5 + $0x2] ss:$4 sm:$0xf] }
  0x86   : > { %607 = vrot.lane.b32.xlu1 %v1763_v42, %s1547_s23  ;;  %688 = vrot.lane.b32.xlu2 %v1785_v43, %s1546_s18 }
  0x8d   : > { %690 = vrot.lane.b32.xlu0 %v1793_v44, %s1546_s18 }
  0x8e   : > { %700 = vrot.lane.b32.xlu1 %v1796_v45, %s1546_s18  ;;  %702 = vrot.lane.b32.xlu2 %v1799_v46, %s1546_s18 }
  0x90   : > { %v1807_v47 = vpop.permute.xlu2 %312 }
  0x95   : > { %704 = vrot.lane.b32.xlu0 %v1810_v48, %s1546_s18 }
  0x96   : > { %706 = vrot.lane.b32.xlu1 %v1813_v49, %s1546_s18  ;;  %708 = vrot.lane.b32.xlu2 %v1816_v50, %s1546_s18 }
  0x98   : > { %v1824_v51 = vpop.permute.xlu2 %314 }
  0x9d   : > { %710 = vrot.lane.b32.xlu0 %v1827_v52, %s1546_s18 }
  0x9e   : > { %780 = vrot.lane.b32.xlu1 %v1796_v45, %s1547_s23  ;;  %782 = vrot.lane.b32.xlu2 %v1799_v46, %s1547_s23 }
  0xa0   : > { %v1835_v53 = vpop.permute.xlu2 %354 }
  0xa5   : > { %784 = vrot.lane.b32.xlu0 %v1810_v48, %s1547_s23 }
  0xa6   : > { %786 = vrot.lane.b32.xlu1 %v1785_v43, %s1547_s23  ;;  %788 = vrot.lane.b32.xlu2 %v1813_v49, %s1547_s23 }
  0xa7   : > { %v255_v54 = vpop.permute.xlu0 %254 }
  0xa8   : > { %v263_v56 = vpop.permute.xlu1 %262  ;;  %v1843_v57 = vpop.permute.xlu2 %364 }
  0xa9   : > { %v368_v55 = vsel %vm266_vm2, %v1843_v57, %v1835_v53 }
  0xad   : > { %790 = vrot.lane.b32.xlu0 %v1816_v50, %s1547_s23 }
  0xae   : > { %792 = vrot.lane.b32.xlu1 %v1827_v52, %s1547_s23  ;;  %794 = vrot.lane.b32.xlu2 %v1793_v44, %s1547_s23 }
  0xaf   : > { %v261_v3 = vpop.permute.xlu0 %260 }
  0xb0   : > { %v265_v7 = vpop.permute.xlu1 %264  ;;  %v267_v14 = vsel %vm266_vm2, %v261_v3, %v263_v56  ;;  %v1862_v19 = vpop.permute.xlu2 %416  ;;  %v274_v22 = vsel %vm266_vm2, %v255_v54, %v261_v3 }
  0xb1   : > { %v268_v15 = vsel %vm266_vm2, %v263_v56, %v265_v7  ;;  %v269_v5 = vsel %vm266_vm2, %v265_v7, %v255_v54  ;;  %v286_v18 = vmul.f32 %v278_v62, %v267_v14  ;;  %v285_v38 = vmul.f32 %v277_v17, %v274_v22 }
  0xb2   : > { %v287_v8 = vmul.f32 %v279_v0, %v268_v15  ;;  %v288_v21 = vmul.f32 %v280_v1, %v269_v5  ;;  %v380_v54 = vperm.slane %v1869_v28, 3  ;;  %v336_v56 = vperm.slane %v331_v36, 3  ;;  %v1899_v5 = vld [vmem:[%s1671_s30 + $0x30] sm:$0xff] }
  0xb3   : > { %v290_v29 = vadd.f32 %v286_v18, %v1850_v4  ;;  %v397_v0 = vperm.slane %v394_v31, 1  ;;  %v289_v1 = vadd.f32 %v285_v38, %v1880_v37  ;;  %v334_v14 = vperm.slane %v331_v36, 1 }
  0xb4   : > { %v291_v32 = vadd.f32 %v287_v8, %v1855_v10  ;;  %v292_v33 = vadd.f32 %v288_v21, %v1857_v13  ;;  %v335_v15 = vperm.slane %v331_v36, 2  ;;  %v396_v17 = vperm.slane %v394_v31, 0 }
  0xb5   : > { %845 = vrot.lane.b32.xlu0 %v1867_v24, %s1546_s18  ;;  %v309_v39 = vadd.f32 %v305_v6, %v290_v29  ;;  %v388_v6 = vmul.f32 %v380_v54, %v368_v55  ;;  %v333_v18 = vperm.slane %v331_v36, 0  ;;  %v407_v8 = vmul.f32 %v399_v61, %v1714_v16  ;;  %v987_v36 = vld [vmem:[%s1671_s30 + $0x38] sm:$0xfe] }
  0xb6   : > { %851 = vrot.lane.b32.xlu1 %v1873_v30, %s1546_s18  ;;  %v311_v58 = vadd.f32 %v307_v2, %v292_v33  ;;  %v310_v59 = vadd.f32 %v306_v20, %v291_v32  ;;  %853 = vrot.lane.b32.xlu2 %v1878_v34, %s1546_s18  ;;  %v398_v21 = vperm.slane %v394_v31, 2  ;;  %v321_v22 = vsel %vm320_vm3, %v1807_v47, %v1824_v51 }
  0xb7   : > { %v317_v60 = vpop.permute.xlu0 %316  ;;  %v308_v32 = vadd.f32 %v304_v63, %v289_v1  ;;  %v379_v33 = vperm.slane %v1869_v28, 2  ;;  %v378_v16 = vperm.slane %v1869_v28, 1  ;;  %v341_v31 = vmul.f32 %v333_v18, %v321_v22  ;;  %v985_v18 = vld [vmem:[%s1671_s30 + $0x28] sm:$0xfe] }
  0xb8   : > { %v319_v62 = vpop.permute.xlu1 %318  ;;  %v1896_v3 = vpop.permute.xlu2 %460  ;;  %v322_v9 = vsel %vm320_vm3, %v1824_v51, %v317_v60  ;;  %v404_v51 = vmul.f32 %v396_v17, %v1726_v23  ;;  %v406_v55 = vmul.f32 %v398_v21, %v1735_v27  ;;  %v995_v63 = vrot.slane %v987_v36, 1 }
  0xb9   : > { %v329_v2 = vsel %vm320_vm3, %v319_v62, %v1807_v47  ;;  %v323_v20 = vsel %vm320_vm3, %v317_v60, %v319_v62  ;;  %v342_v54 = vmul.f32 %v334_v14, %v322_v9  ;;  %v405_v47 = vmul.f32 %v397_v0, %v1729_v25 }
  0xba   : > { %v344_v7 = vmul.f32 %v336_v56, %v329_v2  ;;  %v343_v56 = vmul.f32 %v335_v15, %v323_v20  ;;  %v345_v28 = vadd.f32 %v341_v31, %v308_v32  ;;  %v984_v15 = vld [vmem:[%s1671_s30 + $0x20] sm:$0xfe]  ;;  %v1931_v9 = vsel %vm525_vm1, %v995_v63, 0.0  ;;  %v986_v20 = vld [vmem:[%s1671_s30 + $0x30] sm:$0xfe] }
  0xbb   : > { %v346_v2 = vadd.f32 %v342_v54, %v309_v39  ;;  %v993_v22 = vrot.slane %v985_v18, 1  ;;  %v552_v36 = vperm.slane %v1707_v12, 3 }
  0xbc   : > { %v348_v29 = vadd.f32 %v344_v7, %v311_v58 }
  0xbd   : > { %855 = vrot.lane.b32.xlu0 %v1899_v5, %s1546_s18  ;;  %v560_v12 = vmul.f32 %v552_v36, %v1760_v41 }
  0xbe   : > { %v392_v38 = vadd.f32 %v388_v6, %v348_v29  ;;  %933 = vrot.lane.b32.xlu1 %v1873_v30, %s1547_s23  ;;  %935 = vrot.lane.b32.xlu2 %v1878_v34, %s1547_s23  ;;  %v347_v6 = vadd.f32 %v343_v56, %v310_v59  ;;  %v992_v59 = vrot.slane %v984_v15, 1  ;;  %v1944_v29 = vld [vmem:[#allocation5 + $0x20] ss:$4 sm:$0xf]  ;;  %v1954_v56 = vsel %vm525_vm1, %v993_v22, 0.0 }
  0xbf   : > { %v361_v58 = vpop.permute.xlu0 %360  ;;  %v504_v54 = vperm.slane %v1944_v29, 3  ;;  %v582_v41 = vrot.slane %v560_v12, 1  ;;  %v501_v22 = vperm.slane %v1944_v29, 0 }
  0xc0   : > { %v363_v60 = vpop.permute.xlu1 %362  ;;  %v373_v61 = vsel %vm266_vm2, %v1835_v53, %v361_v58  ;;  %v411_v62 = vadd.f32 %v407_v8, %v392_v38  ;;  %v1926_v1 = vpop.permute.xlu2 %474  ;;  %v1950_v38 = vsel %vm525_vm1, %v992_v59, 0.0 }
  0xc1   : > { %v367_v25 = vsel %vm266_vm2, %v363_v60, %v1843_v57  ;;  %v366_v23 = vsel %vm266_vm2, %v361_v58, %v363_v60  ;;  %v385_v0 = vmul.f32 %v377_v11, %v373_v61  ;;  %v564_v58 = vmul.f32 %v552_v36, %v1763_v42 }
  0xc2   : > { %v387_v27 = vmul.f32 %v379_v33, %v367_v25  ;;  %v386_v7 = vmul.f32 %v378_v16, %v366_v23  ;;  %v994_v33 = vrot.slane %v986_v20, 1  ;;  %v503_v20 = vperm.slane %v1944_v29, 2 }
  0xc3   : > { %v389_v14 = vadd.f32 %v385_v0, %v345_v28  ;;  %v583_v0 = vrot.slane %v564_v58, 1 }
  0xc4   : > { %v391_v53 = vadd.f32 %v387_v27, %v347_v6  ;;  %v390_v17 = vadd.f32 %v386_v7, %v346_v2 }
  0xc5   : > { %937 = vrot.lane.b32.xlu0 %v1899_v5, %s1547_s23  ;;  %v1935_v57 = vadd.f32 %v404_v51, %v389_v14  ;;  %v1959_v51 = vsel %vm525_vm1, %v994_v33, 0.0  ;;  %v584_v7 = vsel %vm525_vm1, %v582_v41, %v583_v0 }
  0xc6   : > { %939 = vrot.lane.b32.xlu1 %v1867_v24, %s1547_s23  ;;  %v1940_v39 = vadd.f32 %v405_v47, %v390_v17  ;;  %v1942_v8 = vadd.f32 %v406_v55, %v391_v53  ;;  %1005 = vrot.lane.b32.xlu2 %v1931_v9, %s1546_s18  ;;  %v430_v47 = vld [vmem:[#allocation5 + $0x12] ss:$4 sm:$0xf] }
  0xc7   : > { %v413_v21 = vpop.permute.xlu0 %412  ;;  %v435_v31 = vperm.slane %v430_v47, 3  ;;  %v433_v33 = vperm.slane %v430_v47, 1  ;;  %v432_v36 = vperm.slane %v430_v47, 0  ;;  %v434_v58 = vperm.slane %v430_v47, 2 }
  0xc8   : > { %v415_v32 = vpop.permute.xlu1 %414  ;;  %v481_v11 = vpop.permute.xlu2 %480 }
  0xc9   : > { %v487_v16 = vsel %vm266_vm2, %v481_v11, %v1896_v3  ;;  %v420_v12 = vsel %vm320_vm3, %v413_v21, %v415_v32 }
  0xca   : > { %v516_v55 = vmul.f32 %v504_v54, %v487_v16  ;;  %v440_v41 = vmul.f32 %v432_v36, %v420_v12 }
  0xcc   : > { %v536_v2 = vrot.slane %v516_v55, 1 }
  0xcd   : > { %1011 = vrot.lane.b32.xlu0 %v1950_v38, %s1546_s18 }
  0xce   : > { %1013 = vrot.lane.b32.xlu1 %v1954_v56, %s1546_s18  ;;  %1015 = vrot.lane.b32.xlu2 %v1959_v51, %s1546_s18 }
  0xcf   : > { %v419_v60 = vpop.permute.xlu0 %418 }
  0xd0   : > { %v459_v61 = vpop.permute.xlu1 %458  ;;  %v428_v63 = vsel %vm320_vm3, %v419_v60, %v413_v21  ;;  %v1972_v23 = vpop.permute.xlu2 %597 }
  0xd1   : > { %v484_v25 = vsel %vm266_vm2, %v1926_v1, %v459_v61  ;;  %v443_v28 = vmul.f32 %v435_v31, %v428_v63  ;;  %v421_v31 = vsel %vm320_vm3, %v415_v32, %v1862_v19 }
  0xd2   : > { %v512_v42 = vmul.f32 %v504_v54, %v484_v25  ;;  %v502_v54 = vperm.slane %v1944_v29, 1  ;;  %v441_v29 = vmul.f32 %v433_v33, %v421_v31 }
  0xd3   : > { %v447_v6 = vadd.f32 %v443_v28, %v411_v62 }
  0xd4   : > { %v535_v27 = vrot.slane %v512_v42, 1 }
  0xd5   : > { %1093 = vrot.lane.b32.xlu0 %v1950_v38, %s1547_s23 }
  0xd6   : > { %v537_v14 = vsel %vm525_vm1, %v535_v27, %v536_v2  ;;  %1095 = vrot.lane.b32.xlu1 %v1954_v56, %s1547_s23  ;;  %1097 = vrot.lane.b32.xlu2 %v1959_v51, %s1547_s23 }
  0xd7   : > { %v545_v15 = vadd.f32 %v537_v14, %v447_v6  ;;  %v471_v53 = vpop.permute.xlu0 %470 }
  0xd8   : > { %v473_v17 = vpop.permute.xlu1 %472  ;;  %v1984_v62 = vpop.permute.xlu2 %603  ;;  %v496_v16 = vsel %vm266_vm2, %v459_v61, %v471_v53 }
  0xd9   : > { %v1982_v18 = vadd.f32 %v584_v7, %v545_v15  ;;  %v483_v59 = vsel %vm266_vm2, %v473_v17, %v1926_v1  ;;  %v482_v55 = vsel %vm266_vm2, %v471_v53, %v473_v17  ;;  %v422_v1 = vsel %vm320_vm3, %v1862_v19, %v419_v60 }
  0xda   : > { %v511_v63 = vmul.f32 %v503_v20, %v483_v59  ;;  %v509_v25 = vmul.f32 %v501_v22, %v496_v16  ;;  %v510_v61 = vmul.f32 %v502_v54, %v482_v55  ;;  %v442_v21 = vmul.f32 %v434_v58, %v422_v1  ;;  %v628_v58 = vld [vmem:[#allocation5 + $0x22] ss:$4 sm:$0xf] }
  0xdb   : > { %v444_v15 = vadd.f32 %v440_v41, %v1935_v57  ;;  %v630_v1 = vperm.slane %v628_v58, 0 }
  0xdc   : > { %v532_v27 = vrot.slane %v511_v63, 1  ;;  %v526_v7 = vrot.slane %v509_v25, 1  ;;  %v529_v53 = vrot.slane %v510_v61, 1  ;;  %v446_v33 = vadd.f32 %v442_v21, %v1942_v8 }
  0xdd   : > { %1099 = vrot.lane.b32.xlu0 %v1931_v9, %s1547_s23 }
  0xdf   : > { %v477_v28 = vpop.permute.xlu0 %476 }
  0xe0   : > { %v479_v0 = vpop.permute.xlu1 %478  ;;  %v497_v42 = vsel %vm266_vm2, %v1896_v3, %v477_v28  ;;  %v2004_v6 = vpop.permute.xlu2 %688  ;;  %v445_v3 = vadd.f32 %v441_v29, %v1940_v39 }
  0xe1   : > { %v486_v32 = vsel %vm266_vm2, %v479_v0, %v481_v11  ;;  %v485_v47 = vsel %vm266_vm2, %v477_v28, %v479_v0  ;;  %v513_v2 = vmul.f32 %v501_v22, %v497_v42  ;;  %v632_v42 = vperm.slane %v628_v58, 2 }
  0xe2   : > { %v515_v19 = vmul.f32 %v503_v20, %v486_v32  ;;  %v514_v60 = vmul.f32 %v502_v54, %v485_v47  ;;  %v633_v32 = vperm.slane %v628_v58, 3 }
  0xe3   : > { %v527_v14 = vrot.slane %v513_v2, 1 }
  0xe4   : > { %v533_v17 = vrot.slane %v515_v19, 1  ;;  %v530_v59 = vrot.slane %v514_v60, 1 }
  0xe5   : > { %v528_v11 = vsel %vm525_vm1, %v526_v7, %v527_v14 }
  0xe6   : > { %v534_v22 = vsel %vm525_vm1, %v532_v27, %v533_v17  ;;  %v531_v36 = vsel %vm525_vm1, %v529_v53, %v530_v59  ;;  %v542_v16 = vadd.f32 %v528_v11, %v444_v15  ;;  %v2039_v11 = vld [vmem:[#allocation5 + $0x1] ss:$4 sm:$0xf] }
  0xe7   : > { %v544_v20 = vadd.f32 %v534_v22, %v446_v33  ;;  %v543_v54 = vadd.f32 %v531_v36, %v445_v3  ;;  %v594_v31 = vpop.permute.xlu0 %593 }
  0xe8   : > { %v596_v12 = vpop.permute.xlu1 %595  ;;  %v589_v57 = vadd.f32 %v1747_v35, %v542_v16  ;;  %v2013_v55 = vpop.permute.xlu2 %702  ;;  %v631_v35 = vperm.slane %v628_v58, 1  ;;  %v756_v58 = vperm.slane %v2039_v11, 0 }
  0xe9   : > { %v590_v39 = vadd.f32 %v1732_v26, %v543_v54  ;;  %v591_v8 = vadd.f32 %v1757_v40, %v544_v20  ;;  %v609_v63 = vsel %vm320_vm3, %v594_v31, %v596_v12  ;;  %v610_v26 = vsel %vm320_vm3, %v596_v12, %v1972_v23 }
  0xea   : > { %v638_v28 = vmul.f32 %v630_v1, %v609_v63  ;;  %v639_v19 = vmul.f32 %v631_v35, %v610_v26 }
  0xec   : > { %v654_v21 = vrot.slane %v638_v28, 1  ;;  %v657_v16 = vrot.slane %v639_v19, 1 }
  0xef   : > { %v600_v25 = vpop.permute.xlu0 %599 }
  0xf0   : > { %v602_v29 = vpop.permute.xlu1 %601  ;;  %v2020_v61 = vpop.permute.xlu2 %708  ;;  %v611_v47 = vsel %vm320_vm3, %v1972_v23, %v600_v25  ;;  %v625_v2 = vsel %vm320_vm3, %v600_v25, %v594_v31 }
  0xf1   : > { %v612_v41 = vsel %vm320_vm3, %v602_v29, %v1984_v62  ;;  %v640_v14 = vmul.f32 %v632_v42, %v611_v47  ;;  %v641_v15 = vmul.f32 %v633_v32, %v625_v2 }
  0xf2   : > { %v642_v0 = vmul.f32 %v630_v1, %v612_v41 }
  0xf3   : > { %v660_v54 = vrot.slane %v640_v14, 1  ;;  %v663_v31 = vrot.slane %v641_v15, 1 }
  0xf4   : > { %v655_v40 = vrot.slane %v642_v0, 1 }
  0xf6   : > { %v656_v27 = vsel %vm525_vm1, %v654_v21, %v655_v40  ;;  %v764_v40 = vmul.f32 %v756_v58, %v1796_v45 }
  0xf7   : > { %v670_v60 = vadd.f32 %v656_v27, %v589_v57  ;;  %v606_v7 = vpop.permute.xlu0 %605 }
  0xf8   : > { %v608_v53 = vpop.permute.xlu1 %607  ;;  %v613_v17 = vsel %vm320_vm3, %v1984_v62, %v606_v7  ;;  %v2037_v33 = vpop.permute.xlu2 %782  ;;  %v2041_v62 = vld [vmem:[#allocation5] ss:$4 sm:$0xf] }
  0xf9   : > { %674 = vst [vmem:[%s2032_s26] sm:$0xff] %v670_v60  ;;  %v626_v23 = vsel %vm320_vm3, %v608_v53, %v602_v29  ;;  %v614_v59 = vsel %vm320_vm3, %v606_v7, %v608_v53  ;;  %v643_v3 = vmul.f32 %v631_v35, %v613_v17  ;;  %v730_v29 = vperm.slane %v2041_v62, 0 }
  0xfa   : > { %v645_v22 = vmul.f32 %v633_v32, %v626_v23  ;;  %v644_v36 = vmul.f32 %v632_v42, %v614_v59  ;;  %v732_v47 = vperm.slane %v2041_v62, 2  ;;  %v733_v2 = vperm.slane %v2041_v62, 3 }
  0xfb   : > { %v658_v20 = vrot.slane %v643_v3, 1 }
  0xfc   : > { %v664_v12 = vrot.slane %v645_v22, 1  ;;  %v661_v57 = vrot.slane %v644_v36, 1 }
  0xfd   : > { %v659_v1 = vsel %vm525_vm1, %v657_v16, %v658_v20 }
  0xfe   : > { %v665_v63 = vsel %vm525_vm1, %v663_v31, %v664_v12  ;;  %v662_v25 = vsel %vm525_vm1, %v660_v54, %v661_v57  ;;  %v671_v28 = vadd.f32 %v659_v1, %v590_v39  ;;  %v899_v57 = vld [vmem:[#allocation5 + $0x11] ss:$4 sm:$0xf] }
  0xff   : > { %v673_v41 = vadd.f32 %v665_v63, %v1982_v18  ;;  %v672_v0 = vadd.f32 %v662_v25, %v591_v8  ;;  %v691_v35 = vpop.permute.xlu0 %690  ;;  %v759_v18 = vperm.slane %v2039_v11, 3  ;;  %v758_v8 = vperm.slane %v2039_v11, 2 }
 0x100   : > { %675 = vst [vmem:[%s2032_s26 + $0x8] sm:$0xff] %v671_v28  ;;  %v701_v42 = vpop.permute.xlu1 %700  ;;  %v2053_v21 = vpop.permute.xlu2 %788  ;;  %v901_v25 = vperm.slane %v899_v57, 0  ;;  %v904_v28 = vperm.slane %v899_v57, 3 }
 0x101   : > { %677 = vst [vmem:[%s2032_s26 + $0x18] sm:$0xff] %v673_v41  ;;  %v726_v26 = vsel %vm266_vm2, %v2004_v6, %v701_v42  ;;  %v767_v14 = vmul.f32 %v759_v18, %v1785_v43  ;;  %v766_v15 = vmul.f32 %v758_v8, %v1810_v48  ;;  %v771_v48 = vmul.f32 %v759_v18, %v1793_v44 }
 0x102   : > { %676 = vst [vmem:[%s2032_s26 + $0x10] sm:$0xff] %v672_v0  ;;  %v738_v39 = vmul.f32 %v730_v29, %v726_v26  ;;  %v731_v41 = vperm.slane %v2041_v62, 1  ;;  %v757_v0 = vperm.slane %v2039_v11, 1  ;;  %v712_v44 = vsel %vm266_vm2, %v701_v42, %v2013_v55 }
 0x103   : > { %v902_v18 = vperm.slane %v899_v57, 1 }
 0x104   : > { %v746_v32 = vadd.f32 %v738_v39, %v1880_v37  ;;  %v765_v42 = vmul.f32 %v757_v0, %v1799_v46 }
 0x106   : > { %v2064_v27 = vadd.f32 %v764_v40, %v746_v32  ;;  %v2105_v40 = vmul.f32 %v904_v28, %v1867_v24  ;;  %v903_v32 = vperm.slane %v899_v57, 2  ;;  %v2117_v24 = vmul.f32 %v758_v8, %v1827_v52  ;;  %v2130_v52 = vld [vmem:[#allocation5 + $0x10] ss:$4 sm:$0xf] }
 0x107   : > { %v705_v19 = vpop.permute.xlu0 %704 }
 0x108   : > { %v707_v60 = vpop.permute.xlu1 %706  ;;  %v713_v7 = vsel %vm266_vm2, %v2013_v55, %v705_v19  ;;  %v714_v45 = vsel %vm266_vm2, %v705_v19, %v2004_v6  ;;  %v2076_v3 = vpop.permute.xlu2 %794 }
 0x109   : > { %v740_v53 = vmul.f32 %v732_v47, %v713_v7  ;;  %v741_v17 = vmul.f32 %v733_v2, %v714_v45  ;;  %v727_v39 = vsel %vm266_vm2, %v691_v35, %v707_v60  ;;  %v739_v7 = vmul.f32 %v731_v41, %v712_v44  ;;  %v2110_v45 = vld [vmem:[#allocation5 + $0x2] ss:$4 sm:$0xf] }
 0x10a   : > { %v817_v46 = vperm.slane %v2110_v45, 1  ;;  %v818_v57 = vperm.slane %v2110_v45, 2 }
 0x10b   : > { %v748_v23 = vadd.f32 %v740_v53, %v1855_v10  ;;  %v749_v59 = vadd.f32 %v741_v17, %v1857_v13  ;;  %v2123_v17 = vmul.f32 %v903_v32, %v1899_v5  ;;  %v747_v11 = vadd.f32 %v739_v7, %v1850_v4 }
 0x10d   : > { %v2078_v22 = vadd.f32 %v767_v14, %v749_v59  ;;  %v2080_v36 = vadd.f32 %v766_v15, %v748_v23  ;;  %v769_v14 = vmul.f32 %v757_v0, %v1816_v50  ;;  %v2126_v23 = vmul.f32 %v902_v18, %v1878_v34 }
 0x10e   : > { %v773_v0 = vadd.f32 %v765_v42, %v747_v11  ;;  %v870_v11 = vperm.slane %v2130_v52, 3 }
 0x10f   : > { %v711_v16 = vpop.permute.xlu0 %710 }
 0x110   : > { %v2082_v6 = vpop.permute.xlu1 %780  ;;  %v717_v43 = vsel %vm266_vm2, %v711_v16, %v691_v35  ;;  %v2087_v31 = vpop.permute.xlu2 %853  ;;  %v742_v35 = vmul.f32 %v730_v29, %v727_v39  ;;  %v813_v29 = vsel %vm320_vm3, %v2076_v3, %v2053_v21 }
 0x111   : > { %v745_v20 = vmul.f32 %v733_v2, %v717_v43  ;;  %v715_v2 = vsel %vm266_vm2, %v707_v60, %v2020_v61  ;;  %v920_v60 = vrot.slane %v2105_v40, 1  ;;  %v796_v50 = vsel %vm320_vm3, %v2082_v6, %v2037_v33 }
 0x112   : > { %v743_v53 = vmul.f32 %v731_v41, %v715_v2  ;;  %v750_v34 = vadd.f32 %v742_v35, %v1880_v37  ;;  %v918_v37 = vrot.slane %v2126_v23, 1 }
 0x113   : > { %v753_v54 = vadd.f32 %v745_v20, %v1857_v13  ;;  %v2102_v13 = vmul.f32 %v901_v25, %v1873_v30  ;;  %v768_v30 = vmul.f32 %v756_v58, %v1813_v49  ;;  %v816_v49 = vperm.slane %v2110_v45, 0 }
 0x114   : > { %v819_v58 = vperm.slane %v2110_v45, 3  ;;  %v751_v43 = vadd.f32 %v743_v53, %v1850_v4  ;;  %v868_v20 = vperm.slane %v2130_v52, 1 }
 0x115   : > { %v2089_v12 = vadd.f32 %v771_v48, %v753_v54  ;;  %v917_v15 = vrot.slane %v2102_v13, 1  ;;  %v716_v48 = vsel %vm266_vm2, %v2020_v61, %v711_v16  ;;  %v824_v54 = vmul.f32 %v816_v49, %v796_v50 }
 0x116   : > { %v744_v61 = vmul.f32 %v732_v47, %v716_v48  ;;  %v776_v16 = vadd.f32 %v768_v30, %v750_v34  ;;  %v950_v48 = vld [vmem:[#allocation5 + $0x12] ss:$4 sm:$0xf] }
 0x117   : > { %v2091_v1 = vpop.permute.xlu0 %784  ;;  %v832_v42 = vadd.f32 %v824_v54, %v2064_v27  ;;  %v1059_v27 = vld [vmem:[#allocation5 + $0x21] ss:$4 sm:$0xf] }
 0x118   : > { %v2093_v63 = vpop.permute.xlu1 %786  ;;  %v2099_v26 = vpop.permute.xlu2 %935  ;;  %v797_v5 = vsel %vm320_vm3, %v2037_v33, %v2091_v1  ;;  %v867_v33 = vperm.slane %v2130_v52, 0 }
 0x119   : > { %v825_v25 = vmul.f32 %v817_v46, %v797_v5  ;;  %v812_v2 = vsel %vm320_vm3, %v2093_v63, %v2082_v6  ;;  %v798_v62 = vsel %vm320_vm3, %v2091_v1, %v2093_v63  ;;  %v919_v63 = vrot.slane %v2123_v17, 1 }
 0x11a   : > { %v827_v6 = vmul.f32 %v819_v58, %v812_v2 }
 0x11b   : > { %v833_v47 = vadd.f32 %v825_v25, %v773_v0  ;;  %v1061_v0 = vperm.slane %v1059_v27, 0 }
 0x11f   : > { %v791_v19 = vpop.permute.xlu0 %790 }
 0x120   : > { %v793_v55 = vpop.permute.xlu1 %792  ;;  %v799_v8 = vsel %vm320_vm3, %v2053_v21, %v791_v19  ;;  %v2154_v41 = vpop.permute.xlu2 %1005  ;;  %v831_v21 = vmul.f32 %v819_v58, %v813_v29  ;;  %v1062_v29 = vperm.slane %v1059_v27, 1 }
 0x121   : > { %v800_v59 = vsel %vm320_vm3, %v791_v19, %v793_v55  ;;  %v828_v44 = vmul.f32 %v816_v49, %v799_v8  ;;  %v777_v19 = vadd.f32 %v769_v14, %v751_v43  ;;  %v801_v30 = vsel %vm320_vm3, %v793_v55, %v2076_v3 }
 0x122   : > { %v829_v4 = vmul.f32 %v817_v46, %v800_v59  ;;  %v752_v46 = vadd.f32 %v744_v61, %v1855_v10  ;;  %v869_v14 = vperm.slane %v2130_v52, 2  ;;  %v826_v3 = vmul.f32 %v818_v57, %v798_v62 }
 0x123   : > { %v836_v35 = vadd.f32 %v828_v44, %v776_v16  ;;  %v830_v55 = vmul.f32 %v818_v57, %v801_v30  ;;  %v2188_v57 = vld [vmem:[#allocation5 + $0x20] ss:$4 sm:$0xf]  ;;  %v839_v13 = vadd.f32 %v831_v21, %v2089_v12  ;;  %v952_v61 = vperm.slane %v950_v48, 0 }
 0x124   : > { %v837_v53 = vadd.f32 %v829_v4, %v777_v19  ;;  %v778_v17 = vadd.f32 %v2117_v24, %v752_v46  ;;  %v1030_v16 = vperm.slane %v2188_v57, 3  ;;  %v1063_v21 = vperm.slane %v1059_v27, 2 }
 0x125   : > { %v1070_v40 = vmul.f32 %v1062_v29, %v1954_v56 }
 0x127   : > { %v846_v28 = vpop.permute.xlu0 %845 }
 0x128   : > { %v852_v39 = vpop.permute.xlu1 %851  ;;  %v1016_v25 = vpop.permute.xlu2 %1015 }
 0x129   : > { %v857_v32 = vsel %vm266_vm2, %v852_v39, %v2087_v31  ;;  %v864_v18 = vsel %vm266_vm2, %v846_v28, %v852_v39  ;;  %v1064_v39 = vperm.slane %v1059_v27, 3  ;;  %v1071_v27 = vmul.f32 %v1063_v21, %v1959_v51 }
 0x12a   : > { %v876_v7 = vmul.f32 %v868_v20, %v857_v32  ;;  %v875_v45 = vmul.f32 %v867_v33, %v864_v18  ;;  %v1019_v32 = vsel %vm266_vm2, %v1016_v25, %v2154_v41 }
 0x12b   : > { %v1079_v29 = vrot.slane %v1071_v27, 1 }
 0x12c   : > { %v884_v23 = vrot.slane %v876_v7, 1  ;;  %v883_v49 = vrot.slane %v875_v45, 1 }
 0x12e   : > { %v892_v50 = vadd.f32 %v884_v23, %v833_v47  ;;  %v896_v5 = vadd.f32 %v884_v23, %v837_v53  ;;  %v891_v34 = vadd.f32 %v883_v49, %v832_v42  ;;  %v895_v1 = vadd.f32 %v883_v49, %v836_v35 }
 0x12f   : > { %v856_v8 = vpop.permute.xlu0 %855  ;;  %v954_v35 = vperm.slane %v950_v48, 2  ;;  %v1038_v23 = vmul.f32 %v1030_v16, %v1019_v32  ;;  %v1072_v49 = vmul.f32 %v1064_v39, %v1931_v9  ;;  %v1027_v9 = vperm.slane %v2188_v57, 0 }
 0x130   : > { %v934_v59 = vpop.permute.xlu1 %933  ;;  %v2176_v10 = vadd.f32 %v917_v15, %v891_v34  ;;  %v2180_v58 = vadd.f32 %v917_v15, %v895_v1  ;;  %v858_v52 = vsel %vm266_vm2, %v2087_v31, %v856_v8  ;;  %v859_v43 = vsel %vm266_vm2, %v856_v8, %v846_v28 }
 0x131   : > { %v877_v20 = vmul.f32 %v869_v14, %v858_v52  ;;  %v878_v33 = vmul.f32 %v870_v11, %v859_v43  ;;  %v2186_v54 = vadd.f32 %v918_v37, %v892_v50  ;;  %v835_v15 = vadd.f32 %v827_v6, %v2078_v22 }
 0x132   : > { %v2192_v44 = vadd.f32 %v918_v37, %v896_v5  ;;  %v834_v31 = vadd.f32 %v826_v3, %v2080_v36  ;;  %v838_v28 = vadd.f32 %v830_v55, %v778_v17  ;;  %v941_v22 = vsel %vm320_vm3, %v934_v59, %v2099_v26 }
 0x133   : > { %v885_v4 = vrot.slane %v877_v20, 1  ;;  %v886_v24 = vrot.slane %v878_v33, 1  ;;  %v955_v37 = vperm.slane %v950_v48, 3  ;;  %v953_v36 = vperm.slane %v950_v48, 1 }
 0x134   : > { %v960_v46 = vmul.f32 %v952_v61, %v941_v22  ;;  %v1046_v1 = vrot.slane %v1038_v23, 1  ;;  %v1029_v8 = vperm.slane %v2188_v57, 2  ;;  %v1078_v52 = vrot.slane %v1070_v40, 1 }
 0x135   : > { %v893_v18 = vadd.f32 %v885_v4, %v834_v31  ;;  %v894_v2 = vadd.f32 %v886_v24, %v835_v15  ;;  %v897_v19 = vadd.f32 %v885_v4, %v838_v28  ;;  %v898_v12 = vadd.f32 %v886_v24, %v839_v13  ;;  %v1110_v4 = vld [vmem:[#allocation5 + $0x22] ss:$4 sm:$0xf] }
 0x136   : > { %v1113_v21 = vperm.slane %v1110_v4, 1  ;;  %v1112_v22 = vperm.slane %v1110_v4, 0  ;;  %v1114_v40 = vperm.slane %v1110_v4, 2 }
 0x137   : > { %v928_v7 = vadd.f32 %v920_v60, %v894_v2  ;;  %v932_v45 = vadd.f32 %v920_v60, %v898_v12  ;;  %v938_v42 = vpop.permute.xlu0 %937  ;;  %v927_v62 = vadd.f32 %v919_v63, %v893_v18  ;;  %v931_v47 = vadd.f32 %v919_v63, %v897_v19 }
 0x138   : > { %v940_v30 = vpop.permute.xlu1 %939  ;;  %v942_v53 = vsel %vm320_vm3, %v2099_v26, %v938_v42  ;;  %v1069_v60 = vmul.f32 %v1061_v0, %v1950_v38  ;;  %v1080_v26 = vrot.slane %v1072_v49, 1  ;;  %v968_v63 = vrot.slane %v960_v46, 1 }
 0x139   : > { %v949_v6 = vsel %vm320_vm3, %v940_v30, %v934_v59  ;;  %v943_v14 = vsel %vm320_vm3, %v938_v42, %v940_v30  ;;  %v961_v50 = vmul.f32 %v953_v36, %v942_v53  ;;  %v1028_v59 = vperm.slane %v2188_v57, 1  ;;  %v1098_v42 = vpop.permute.xlu2 %1097 }
 0x13a   : > { %v963_v11 = vmul.f32 %v955_v37, %v949_v6  ;;  %v962_v34 = vmul.f32 %v954_v35, %v943_v14  ;;  %v1077_v56 = vrot.slane %v1069_v60, 1  ;;  %v976_v0 = vadd.f32 %v968_v63, %v2176_v10 }
 0x13b   : > { %v969_v38 = vrot.slane %v961_v50, 1  ;;  %v980_v61 = vadd.f32 %v968_v63, %v2180_v58  ;;  %v1115_v60 = vperm.slane %v1110_v4, 3 }
 0x13c   : > { %v971_v5 = vrot.slane %v963_v11, 1  ;;  %v970_v51 = vrot.slane %v962_v34, 1 }
 0x13d   : > { %v977_v16 = vadd.f32 %v969_v38, %v2186_v54  ;;  %v981_v32 = vadd.f32 %v969_v38, %v2192_v44 }
 0x13e   : > { %v979_v3 = vadd.f32 %v971_v5, %v928_v7  ;;  %v983_v55 = vadd.f32 %v971_v5, %v932_v45  ;;  %v982_v2 = vadd.f32 %v970_v51, %v931_v47 }
 0x13f   : > { %v1012_v43 = vpop.permute.xlu0 %1011 }
 0x140   : > { %v1054_v17 = vadd.f32 %v1046_v1, %v979_v3  ;;  %v1058_v48 = vadd.f32 %v1046_v1, %v983_v55  ;;  %v1014_v20 = vpop.permute.xlu1 %1013  ;;  %v1024_v33 = vsel %vm266_vm2, %v2154_v41, %v1012_v43  ;;  %v978_v41 = vadd.f32 %v970_v51, %v927_v62 }
 0x141   : > { %v1018_v13 = vsel %vm266_vm2, %v1014_v20, %v1016_v25  ;;  %v1017_v15 = vsel %vm266_vm2, %v1012_v43, %v1014_v20  ;;  %v1035_v31 = vmul.f32 %v1027_v9, %v1024_v33 }
 0x142   : > { %v1037_v57 = vmul.f32 %v1029_v8, %v1018_v13  ;;  %v1036_v28 = vmul.f32 %v1028_v59, %v1017_v15  ;;  %v1088_v24 = vadd.f32 %v1080_v26, %v1054_v17  ;;  %v1092_v39 = vadd.f32 %v1080_v26, %v1058_v48 }
 0x143   : > { %v1043_v18 = vrot.slane %v1035_v31, 1 }
 0x144   : > { %v1045_v10 = vrot.slane %v1037_v57, 1  ;;  %v1044_v19 = vrot.slane %v1036_v28, 1 }
 0x145   : > { %v1051_v25 = vadd.f32 %v1043_v18, %v976_v0  ;;  %v1055_v12 = vadd.f32 %v1043_v18, %v980_v61 }
 0x146   : > { %v1053_v37 = vadd.f32 %v1045_v10, %v978_v41  ;;  %v1057_v36 = vadd.f32 %v1045_v10, %v982_v2  ;;  %v1052_v7 = vadd.f32 %v1044_v19, %v977_v16  ;;  %v1056_v45 = vadd.f32 %v1044_v19, %v981_v32 }
 0x147   : > { %v1094_v30 = vpop.permute.xlu0 %1093  ;;  %v1085_v58 = vadd.f32 %v1077_v56, %v1051_v25  ;;  %v1089_v35 = vadd.f32 %v1077_v56, %v1055_v12 }
 0x148   : > { %v1096_v54 = vpop.permute.xlu1 %1095  ;;  %v1086_v53 = vadd.f32 %v1078_v52, %v1052_v7  ;;  %v1090_v44 = vadd.f32 %v1078_v52, %v1056_v45  ;;  %v1087_v23 = vadd.f32 %v1079_v29, %v1053_v37  ;;  %v1091_v62 = vadd.f32 %v1079_v29, %v1057_v36 }
 0x149   : > { %v1102_v47 = vsel %vm320_vm3, %v1096_v54, %v1098_v42  ;;  %v1101_v49 = vsel %vm320_vm3, %v1094_v30, %v1096_v54 }
 0x14a   : > { %v1121_v46 = vmul.f32 %v1113_v21, %v1102_v47  ;;  %v1120_v6 = vmul.f32 %v1112_v22, %v1101_v49 }
 0x14c   : > { %v1129_v14 = vrot.slane %v1121_v46, 1  ;;  %v1128_v11 = vrot.slane %v1120_v6, 1 }
 0x14e   : > { %v1137_v27 = vadd.f32 %v1129_v14, %v1086_v53  ;;  %v1141_v50 = vadd.f32 %v1129_v14, %v1090_v44  ;;  %v1136_v5 = vadd.f32 %v1128_v11, %v1085_v58  ;;  %v1140_v34 = vadd.f32 %v1128_v11, %v1089_v35 }
 0x14f   : > { %v1100_v1 = vpop.permute.xlu0 %1099 }
 0x150   : > { %v1155_v26 = vrot.slane %v1137_v27, 7  ;;  %v1156_v63 = vrot.slane %v1141_v50, 7  ;;  %v1152_v9 = vrot.slane %v1136_v5, 7  ;;  %v1153_v3 = vrot.slane %v1140_v34, 7 }
 0x151   : > { %v1103_v55 = vsel %vm320_vm3, %v1098_v42, %v1100_v1  ;;  %v1109_v8 = vsel %vm320_vm3, %v1100_v1, %v1094_v30 }
 0x152   : > { %v1157_v59 = vsel %vm248_vm0, %v1155_v26, %v1156_v63  ;;  %v1154_v52 = vsel %vm248_vm0, %v1152_v9, %v1153_v3  ;;  %v1122_v56 = vmul.f32 %v1114_v40, %v1103_v55  ;;  %v1123_v29 = vmul.f32 %v1115_v60, %v1109_v8 }
 0x153   : > { %1169 = vst [vmem:[%s2032_s26 + $0x28] sm:$0xff] %v1157_v59 }
 0x154   : > { %1168 = vst [vmem:[%s2032_s26 + $0x20] sm:$0xff] %v1154_v52  ;;  %v1130_v38 = vrot.slane %v1122_v56, 1  ;;  %v1131_v43 = vrot.slane %v1123_v29, 1 }
 0x156   : > { %v1138_v51 = vadd.f32 %v1130_v38, %v1087_v23  ;;  %v1139_v17 = vadd.f32 %v1131_v43, %v1088_v24  ;;  %v1142_v48 = vadd.f32 %v1130_v38, %v1091_v62  ;;  %v1143_v20 = vadd.f32 %v1131_v43, %v1092_v39 }
 0x158   : > { %v1158_v33 = vrot.slane %v1138_v51, 7  ;;  %v1159_v0 = vrot.slane %v1142_v48, 7  ;;  %v1161_v13 = vrot.slane %v1139_v17, 7  ;;  %v1162_v15 = vrot.slane %v1143_v20, 7 }
 0x15a   : > { %v1160_v31 = vsel %vm248_vm0, %v1158_v33, %v1159_v0  ;;  %v1163_v57 = vsel %vm248_vm0, %v1161_v13, %v1162_v15 }
 0x15b   : > { %1170 = vst [vmem:[%s2032_s26 + $0x30] sm:$0xff] %v1160_v31 }
 0x15c   : > { %1171 = vst [vmem:[%s2032_s26 + $0x38] sm:$0xff] %v1163_v57 }
 0x15d   : > { %1495 = shalt.err (!%p1492_p10)
}
 0x15e   : > { %s1548_s22 = smov 512  }
 0x15f   : > { %1314 = dma.vmem_to_hbm [thread:$0]  (%p1635_p3), %s1186_s16, 1024, %s1188_s5, %s1173_s7, %s1548_s22, %s1548_s22, %s1546_s18  }
 0x160 PF: > { %s1202_s30 = sand.u32 1, %s1526_s12   ;;  %p2279_p12 = scmp.ge.s32.totalorder %s1538_s15, 2 }
 0x161   : > { %s1203_s23 = scalar_lea.sflag [#allocation4], %s1202_s30 }
 0x162   : > { %p1328_p13 = pnand %p2279_p12, %p1604_p6 }
 0x164   : > { %p1329_p0 = pneg %p1328_p13 }
 0x166   : > { %1521 = dma.done.wait (%p1329_p0), %s1203_s23, 1024  }
 0x167   : > { %1523 = vsyncadd (%p1329_p0), %s1203_s23, 4294966272  ;;  %p17_p5 = scmp.ge.s32.totalorder %s1625_s6, 4   ;;  %s2280_s12 = smov %s1530_s13 }
 0x168   : > { %s2281_s13 = smov %s1534_s14  ;;  %s2282_s14 = smov %s1641_s10 }
 0x169   : > { %s2283_s15 = smov %s1625_s6  ;;  %19 = sbr.rel (!%p17_p5) target bundleno = 6 (0x6), region = 93 }
 0x16e   :  { %1209 = vsyncpa [#allocation3], 1 }
 0x16f   :  { %1211 = vsyncpa [#allocation3 + $0x1], 1 }
 0x170   :  { %1212 = vsyncpa [#allocation6], 1 }
 0x171   :  { %1213 = vsyncpa [#allocation4], 1 }
 0x172   :  { %1215 = vsyncpa [#allocation4 + $0x1], 1 }

</bundles_post_ra>
